<compile_context>
chip_gen: v7x
topology: tpu7x:2x2x1
jax: 0.10.0
libtpu: 0.0.40
codegen_flags: <defaults>
</compile_context>

<pallas_src>
import functools

import jax
import jax.numpy as jnp
from jax.experimental import pallas as pl
from jax.experimental.pallas import tpu as pltpu


def _fused_unet_up_kernel(
    x_ref, skip_ref, w1_ref, w2_ref, w3_ref, ws_ref, mask_ref,
    o_ref, padx_ref, pads_ref, *, H, W, neg_slope, mxu_dtype,
):
    """Fused UNetUp_1 forward for one batch element.

    x_ref   : (1, c_in,  H, W)      unpadded NCHW input block
    skip_ref: (1, c_skip, H, W)     unpadded NCHW skip block
    w1/w2/w3: (Cout, 9*Cin)         tap-folded conv weight matrices
    ws_ref  : (c_out, 9*c_in)       tap-folded shortcut weight (full concat input)
    mask_ref: (1, H*(W+2)) f32      1.0 on real columns, 0.0 on the 2 phantom cols/row
    o_ref   : (1, c_out, H*(W+2))   lane-dense row-flat output block
    padx_ref, pads_ref: VMEM scratch (C, L) padded row-flat buffers
    """
    f32 = jnp.float32
    Wp = W + 2
    HWp = H * Wp                      # row-flat length (each row keeps its 2 pad cols)
    # padded row-flat length: (H+2) rows of Wp, +2 so the (dy=2, dx=2) tap slice
    # [2*Wp+2 : 2*Wp+2+HWp] stays in bounds.
    L = (H + 2) * Wp + 2

    mask = mask_ref[...]              # (1, HWp), hoisted once

    def fill_padded(dst_ref, img_ref):
        # In-kernel zero padding: memset halo, copy interior rows.
        # dst_ref: (C, L) scratch; img_ref block: (1, C, H, W).
        dst_ref[...] = jnp.zeros_like(dst_ref)
        for h in range(H):
            start = Wp * (h + 1) + 1
            dst_ref[:, start:start + W] = img_ref[0, :, h, :].astype(f32)
        return dst_ref[...]

    def repad(y):
        # y: (C, HWp) row-flat activation, phantom cols already zeroed
        # -> (C, L) zero-padded row-flat input for the next conv.
        z = jnp.zeros((y.shape[0], Wp + 1), f32)
        return jnp.concatenate([z, y, z], axis=1)

    def conv3x3(xpf, w):
        # xpf: (Cin, L) padded row-flat activation; w: (Cout, 9*Cin).
        # Each tap (dy, dx) is a constant lane shift of xpf; folding all 9 taps
        # into the contraction gives a single MXU matmul with K = 9*Cin and a
        # lane-dense N = HWp.
        taps = [xpf[:, dy * Wp + dx: dy * Wp + dx + HWp]
                for dy in range(3) for dx in range(3)]
        patches = jnp.concatenate(taps, axis=0)                     # (9*Cin, HWp)
        return jnp.dot(w.astype(mxu_dtype),
                       patches.astype(mxu_dtype),
                       preferred_element_type=jnp.float32)          # (Cout, HWp)

    def leaky(y):
        return jnp.where(y >= 0.0, y, y * neg_slope)

    # ---- fused forward chain: every intermediate stays on-chip ----
    a0 = fill_padded(padx_ref, x_ref)                               # (c_in, L)
    h1 = leaky(conv3x3(a0, w1_ref[...]) * mask)                     # (c_out, HWp)
    h2 = leaky(conv3x3(repad(h1), w2_ref[...]) * mask)              # (c_in, HWp)
    h3 = conv3x3(repad(h2), w3_ref[...]) * mask                     # (c_out, HWp)
    s0 = fill_padded(pads_ref, skip_ref)                            # (c_skip, L)
    # shortcut conv over concat([h3, skip], channel): stack the padded buffers
    # along channels and do ONE matmul with K = 9*c_in (channel order matches
    # torch.cat((h, skip), 1)).
    cat = jnp.concatenate([repad(h3), s0], axis=0)                  # (c_in, L)
    h4 = conv3x3(cat, ws_ref[...])                                  # (c_out, HWp)

    o_ref[0, :, :] = h4.astype(o_ref.dtype)


def unet_up_1_forward(params, x_nchw, skip_nchw, *, mxu_dtype=jnp.float32):
    """Exact UNetUp_1 forward. Inputs/outputs are NCHW like PyTorch."""
    N, c_in, H, W = x_nchw.shape
    c_skip = skip_nchw.shape[1]
    c_out = params["model_w1"].shape[-1]
    if c_out + c_skip != c_in:
        raise ValueError("UNetUp_1 requires out_size + skip_channels == in_size")

    Wp = W + 2
    HWp = H * Wp
    L = (H + 2) * Wp + 2

    def as_mat(w):
        # (3, 3, Cin, Cout) -> (Cout, 9*Cin); columns are (tap-major,
        # channel-minor), matching the in-kernel tap concatenation order.
        return w.reshape(9 * w.shape[2], w.shape[3]).T

    w1m = as_mat(params["model_w1"])
    w2m = as_mat(params["model_w2"])
    w3m = as_mat(params["model_w3"])
    wsm = as_mat(params["shortcut_w"])   # full (c_out, 9*c_in) concat-input weight

    # 0/1 mask killing the 2 phantom columns per row of the row-flat layout.
    mask = ((jnp.arange(HWp) % Wp) < W).astype(jnp.float32).reshape(1, HWp)

    kernel = functools.partial(_fused_unet_up_kernel, H=H, W=W,
                               neg_slope=0.2, mxu_dtype=mxu_dtype)

    def full2d(arr):
        return pl.BlockSpec(arr.shape, lambda b: (0, 0))

    out_flat = pl.pallas_call(
        kernel,
        out_shape=jax.ShapeDtypeStruct((N, c_out, HWp), x_nchw.dtype),
        grid=(N,),
        in_specs=[
            pl.BlockSpec((1, c_in, H, W), lambda b: (b, 0, 0, 0)),
            pl.BlockSpec((1, c_skip, H, W), lambda b: (b, 0, 0, 0)),
            full2d(w1m), full2d(w2m), full2d(w3m), full2d(wsm),
            full2d(mask),
        ],
        out_specs=pl.BlockSpec((1, c_out, HWp), lambda b: (b, 0, 0)),
        scratch_shapes=[
            pltpu.VMEM((c_in, L), jnp.float32),
            pltpu.VMEM((c_skip, L), jnp.float32),
        ],
        compiler_params=pltpu.CompilerParams(
            dimension_semantics=("parallel",),
        ),
    )(x_nchw, skip_nchw, w1m, w2m, w3m, wsm, mask)

    # Drop the 2 phantom columns per row: (N, Cout, H*Wp) -> (N, Cout, H, W).
    return out_flat.reshape(N, c_out, H, Wp)[:, :, :, :W]


def init_unet_up_1_params(key, in_size, out_size):
    """Deterministic synthetic weights, shapes matching the PyTorch module
    (stored as (3,3,Cin,Cout) = transposed PyTorch (Cout,Cin,3,3))."""
    k1, k2, k3, k4 = jax.random.split(key, 4)

    def w(k, cin, cout):
        scale = 1.0 / jnp.sqrt(9.0 * cin)   # ~ PyTorch default uniform scale
        return jax.random.uniform(
            k, (3, 3, cin, cout), jnp.float32, minval=-scale, maxval=scale)

    return {
        "model_w1": w(k1, in_size, out_size),    # Conv(in -> out)
        "model_w2": w(k2, out_size, in_size),    # Conv(out -> in)
        "model_w3": w(k3, in_size, out_size),    # Conv(in -> out)
        "shortcut_w": w(k4, in_size, out_size),  # Conv(in -> out) on the concat
    }


def _reference_forward(params, x, skip):
    """Pure-JAX (XLA conv) reference for validation."""
    def conv(h, w):
        return jax.lax.conv_general_dilated(
            h, w, window_strides=(1, 1), padding=((1, 1), (1, 1)),
            dimension_numbers=("NCHW", "HWIO", "NCHW"),
            precision=jax.lax.Precision.HIGHEST)

    def lrelu(h):
        return jnp.where(h >= 0, h, 0.2 * h)

    h = lrelu(conv(x, params["model_w1"]))
    h = lrelu(conv(h, params["model_w2"]))
    h = conv(h, params["model_w3"])
    h = jnp.concatenate([h, skip], axis=1)
    return conv(h, params["shortcut_w"])


if __name__ == "__main__":
    # Channel arithmetic of the module requires out_size + C_skip == in_size.
    N, H, W = 2, 16, 16
    in_size, out_size = 8, 4
    skip_ch = in_size - out_size  # 4

    key = jax.random.PRNGKey(0)
    kx, kskip, kparam = jax.random.split(key, 3)

    x = jax.random.normal(kx, (N, in_size, H, W), jnp.float32)        # NCHW
    skip = jax.random.normal(kskip, (N, skip_ch, H, W), jnp.float32)  # NCHW
    params = init_unet_up_1_params(kparam, in_size, out_size)

    fwd = jax.jit(unet_up_1_forward)
    out = jax.block_until_ready(fwd(params, x, skip))

    assert out.shape == (N, out_size, H, W), out.shape
    assert bool(jnp.all(jnp.isfinite(out)))

    ref = jax.block_until_ready(_reference_forward(params, x, skip))
    max_err = float(jnp.max(jnp.abs(out - ref)))
    assert max_err < 1e-2, f"mismatch vs XLA reference: {max_err}"

    print("KERNEL_OK")
</pallas_src>

<mosaic_0001>
module attributes {stable_mosaic.version = 11 : i64} {
  func.func @_fused_unet_up_kernel(%arg0: i32, %arg1: memref<1x8x16x16xf32, #tpu.memory_space<vmem>>, %arg2: memref<1x4x16x16xf32, #tpu.memory_space<vmem>>, %arg3: memref<4x72xf32, #tpu.memory_space<vmem>>, %arg4: memref<8x36xf32, #tpu.memory_space<vmem>>, %arg5: memref<4x72xf32, #tpu.memory_space<vmem>>, %arg6: memref<4x72xf32, #tpu.memory_space<vmem>>, %arg7: memref<1x288xf32, #tpu.memory_space<vmem>>, %arg8: memref<1x4x288xf32, #tpu.memory_space<vmem>>, %arg9: memref<8x326xf32, #tpu.memory_space<vmem>>, %arg10: memref<4x326xf32, #tpu.memory_space<vmem>>) attributes {dimension_semantics = [#tpu.dimension_semantics<parallel>], iteration_bounds = array<i64: 2>, scalar_prefetch = 0 : i64, scratch_operands = 2 : i64, tpu.core_type = #tpu.core_type<tc>, window_params = [{transform_indices = @transform_0, window_bounds = array<i64: 1, 8, 16, 16>}, {transform_indices = @transform_1, window_bounds = array<i64: 1, 4, 16, 16>}, {pipeline_mode = #tpu.pipeline_mode<synchronous>, transform_indices = @transform_2, window_bounds = array<i64: 4, 72>}, {pipeline_mode = #tpu.pipeline_mode<synchronous>, transform_indices = @transform_3, window_bounds = array<i64: 8, 36>}, {pipeline_mode = #tpu.pipeline_mode<synchronous>, transform_indices = @transform_4, window_bounds = array<i64: 4, 72>}, {pipeline_mode = #tpu.pipeline_mode<synchronous>, transform_indices = @transform_5, window_bounds = array<i64: 4, 72>}, {pipeline_mode = #tpu.pipeline_mode<synchronous>, transform_indices = @transform_6, window_bounds = array<i64: 1, 288>}, {transform_indices = @transform_7, window_bounds = array<i64: 1, 4, 288>}]} {
    %c0 = arith.constant 0 : index
    %c0_0 = arith.constant 0 : index
    %0 = vector.load %arg7[%c0, %c0_0] : memref<1x288xf32, #tpu.memory_space<vmem>>, vector<1x288xf32>
    %cst = arith.constant 0.000000e+00 : f32
    %1 = vector.broadcast %cst : f32 to vector<8x326xf32>
    %c0_1 = arith.constant 0 : index
    %c0_2 = arith.constant 0 : index
    %2 = vector.load %arg9[%c0_1, %c0_2] : memref<8x326xf32, #tpu.memory_space<vmem>>, vector<8x326xf32>
    tpu.vector_store %arg9[%c0_1, %c0_2], %1 {strides = array<i32>} : memref<8x326xf32, #tpu.memory_space<vmem>>, vector<8x326xf32>,
    %c0_3 = arith.constant 0 : index
    %c0_4 = arith.constant 0 : index
    %c0_5 = arith.constant 0 : index
    %c0_6 = arith.constant 0 : index
    %3 = vector.load %arg1[%c0_3, %c0_4, %c0_5, %c0_6] : memref<1x8x16x16xf32, #tpu.memory_space<vmem>>, vector<1x8x1x16xf32>
    %4 = vector.shape_cast %3 : vector<1x8x1x16xf32> to vector<8x16xf32>
    %c0_7 = arith.constant 0 : index
    %c19 = arith.constant 19 : index
    %5 = vector.load %arg9[%c0_7, %c19] : memref<8x326xf32, #tpu.memory_space<vmem>>, vector<8x16xf32>
    tpu.vector_store %arg9[%c0_7, %c19], %4 {strides = array<i32>} : memref<8x326xf32, #tpu.memory_space<vmem>>, vector<8x16xf32>,
    %c0_8 = arith.constant 0 : index
    %c0_9 = arith.constant 0 : index
    %c1 = arith.constant 1 : index
    %c0_10 = arith.constant 0 : index
    %6 = vector.load %arg1[%c0_8, %c0_9, %c1, %c0_10] : memref<1x8x16x16xf32, #tpu.memory_space<vmem>>, vector<1x8x1x16xf32>
    %7 = vector.shape_cast %6 : vector<1x8x1x16xf32> to vector<8x16xf32>
    %c0_11 = arith.constant 0 : index
    %c37 = arith.constant 37 : index
    %8 = vector.load %arg9[%c0_11, %c37] : memref<8x326xf32, #tpu.memory_space<vmem>>, vector<8x16xf32>
    tpu.vector_store %arg9[%c0_11, %c37], %7 {strides = array<i32>} : memref<8x326xf32, #tpu.memory_space<vmem>>, vector<8x16xf32>,
    %c0_12 = arith.constant 0 : index
    %c0_13 = arith.constant 0 : index
    %c2 = arith.constant 2 : index
    %c0_14 = arith.constant 0 : index
    %9 = vector.load %arg1[%c0_12, %c0_13, %c2, %c0_14] : memref<1x8x16x16xf32, #tpu.memory_space<vmem>>, vector<1x8x1x16xf32>
    %10 = vector.shape_cast %9 : vector<1x8x1x16xf32> to vector<8x16xf32>
    %c0_15 = arith.constant 0 : index
    %c55 = arith.constant 55 : index
    %11 = vector.load %arg9[%c0_15, %c55] : memref<8x326xf32, #tpu.memory_space<vmem>>, vector<8x16xf32>
    tpu.vector_store %arg9[%c0_15, %c55], %10 {strides = array<i32>} : memref<8x326xf32, #tpu.memory_space<vmem>>, vector<8x16xf32>,
    %c0_16 = arith.constant 0 : index
    %c0_17 = arith.constant 0 : index
    %c3 = arith.constant 3 : index
    %c0_18 = arith.constant 0 : index
    %12 = vector.load %arg1[%c0_16, %c0_17, %c3, %c0_18] : memref<1x8x16x16xf32, #tpu.memory_space<vmem>>, vector<1x8x1x16xf32>
    %13 = vector.shape_cast %12 : vector<1x8x1x16xf32> to vector<8x16xf32>
    %c0_19 = arith.constant 0 : index
    %c73 = arith.constant 73 : index
    %14 = vector.load %arg9[%c0_19, %c73] : memref<8x326xf32, #tpu.memory_space<vmem>>, vector<8x16xf32>
    tpu.vector_store %arg9[%c0_19, %c73], %13 {strides = array<i32>} : memref<8x326xf32, #tpu.memory_space<vmem>>, vector<8x16xf32>,
    %c0_20 = arith.constant 0 : index
    %c0_21 = arith.constant 0 : index
    %c4 = arith.constant 4 : index
    %c0_22 = arith.constant 0 : index
    %15 = vector.load %arg1[%c0_20, %c0_21, %c4, %c0_22] : memref<1x8x16x16xf32, #tpu.memory_space<vmem>>, vector<1x8x1x16xf32>
    %16 = vector.shape_cast %15 : vector<1x8x1x16xf32> to vector<8x16xf32>
    %c0_23 = arith.constant 0 : index
    %c91 = arith.constant 91 : index
    %17 = vector.load %arg9[%c0_23, %c91] : memref<8x326xf32, #tpu.memory_space<vmem>>, vector<8x16xf32>
    tpu.vector_store %arg9[%c0_23, %c91], %16 {strides = array<i32>} : memref<8x326xf32, #tpu.memory_space<vmem>>, vector<8x16xf32>,
    %c0_24 = arith.constant 0 : index
    %c0_25 = arith.constant 0 : index
    %c5 = arith.constant 5 : index
    %c0_26 = arith.constant 0 : index
    %18 = vector.load %arg1[%c0_24, %c0_25, %c5, %c0_26] : memref<1x8x16x16xf32, #tpu.memory_space<vmem>>, vector<1x8x1x16xf32>
    %19 = vector.shape_cast %18 : vector<1x8x1x16xf32> to vector<8x16xf32>
    %c0_27 = arith.constant 0 : index
    %c109 = arith.constant 109 : index
    %20 = vector.load %arg9[%c0_27, %c109] : memref<8x326xf32, #tpu.memory_space<vmem>>, vector<8x16xf32>
    tpu.vector_store %arg9[%c0_27, %c109], %19 {strides = array<i32>} : memref<8x326xf32, #tpu.memory_space<vmem>>, vector<8x16xf32>,
    %c0_28 = arith.constant 0 : index
    %c0_29 = arith.constant 0 : index
    %c6 = arith.constant 6 : index
    %c0_30 = arith.constant 0 : index
    %21 = vector.load %arg1[%c0_28, %c0_29, %c6, %c0_30] : memref<1x8x16x16xf32, #tpu.memory_space<vmem>>, vector<1x8x1x16xf32>
    %22 = vector.shape_cast %21 : vector<1x8x1x16xf32> to vector<8x16xf32>
    %c0_31 = arith.constant 0 : index
    %c127 = arith.constant 127 : index
    %23 = vector.load %arg9[%c0_31, %c127] : memref<8x326xf32, #tpu.memory_space<vmem>>, vector<8x16xf32>
    tpu.vector_store %arg9[%c0_31, %c127], %22 {strides = array<i32>} : memref<8x326xf32, #tpu.memory_space<vmem>>, vector<8x16xf32>,
    %c0_32 = arith.constant 0 : index
    %c0_33 = arith.constant 0 : index
    %c7 = arith.constant 7 : index
    %c0_34 = arith.constant 0 : index
    %24 = vector.load %arg1[%c0_32, %c0_33, %c7, %c0_34] : memref<1x8x16x16xf32, #tpu.memory_space<vmem>>, vector<1x8x1x16xf32>
    %25 = vector.shape_cast %24 : vector<1x8x1x16xf32> to vector<8x16xf32>
    %c0_35 = arith.constant 0 : index
    %c145 = arith.constant 145 : index
    %26 = vector.load %arg9[%c0_35, %c145] : memref<8x326xf32, #tpu.memory_space<vmem>>, vector<8x16xf32>
    tpu.vector_store %arg9[%c0_35, %c145], %25 {strides = array<i32>} : memref<8x326xf32, #tpu.memory_space<vmem>>, vector<8x16xf32>,
    %c0_36 = arith.constant 0 : index
    %c0_37 = arith.constant 0 : index
    %c8 = arith.constant 8 : index
    %c0_38 = arith.constant 0 : index
    %27 = vector.load %arg1[%c0_36, %c0_37, %c8, %c0_38] : memref<1x8x16x16xf32, #tpu.memory_space<vmem>>, vector<1x8x1x16xf32>
    %28 = vector.shape_cast %27 : vector<1x8x1x16xf32> to vector<8x16xf32>
    %c0_39 = arith.constant 0 : index
    %c163 = arith.constant 163 : index
    %29 = vector.load %arg9[%c0_39, %c163] : memref<8x326xf32, #tpu.memory_space<vmem>>, vector<8x16xf32>
    tpu.vector_store %arg9[%c0_39, %c163], %28 {strides = array<i32>} : memref<8x326xf32, #tpu.memory_space<vmem>>, vector<8x16xf32>,
    %c0_40 = arith.constant 0 : index
    %c0_41 = arith.constant 0 : index
    %c9 = arith.constant 9 : index
    %c0_42 = arith.constant 0 : index
    %30 = vector.load %arg1[%c0_40, %c0_41, %c9, %c0_42] : memref<1x8x16x16xf32, #tpu.memory_space<vmem>>, vector<1x8x1x16xf32>
    %31 = vector.shape_cast %30 : vector<1x8x1x16xf32> to vector<8x16xf32>
    %c0_43 = arith.constant 0 : index
    %c181 = arith.constant 181 : index
    %32 = vector.load %arg9[%c0_43, %c181] : memref<8x326xf32, #tpu.memory_space<vmem>>, vector<8x16xf32>
    tpu.vector_store %arg9[%c0_43, %c181], %31 {strides = array<i32>} : memref<8x326xf32, #tpu.memory_space<vmem>>, vector<8x16xf32>,
    %c0_44 = arith.constant 0 : index
    %c0_45 = arith.constant 0 : index
    %c10 = arith.constant 10 : index
    %c0_46 = arith.constant 0 : index
    %33 = vector.load %arg1[%c0_44, %c0_45, %c10, %c0_46] : memref<1x8x16x16xf32, #tpu.memory_space<vmem>>, vector<1x8x1x16xf32>
    %34 = vector.shape_cast %33 : vector<1x8x1x16xf32> to vector<8x16xf32>
    %c0_47 = arith.constant 0 : index
    %c199 = arith.constant 199 : index
    %35 = vector.load %arg9[%c0_47, %c199] : memref<8x326xf32, #tpu.memory_space<vmem>>, vector<8x16xf32>
    tpu.vector_store %arg9[%c0_47, %c199], %34 {strides = array<i32>} : memref<8x326xf32, #tpu.memory_space<vmem>>, vector<8x16xf32>,
    %c0_48 = arith.constant 0 : index
    %c0_49 = arith.constant 0 : index
    %c11 = arith.constant 11 : index
    %c0_50 = arith.constant 0 : index
    %36 = vector.load %arg1[%c0_48, %c0_49, %c11, %c0_50] : memref<1x8x16x16xf32, #tpu.memory_space<vmem>>, vector<1x8x1x16xf32>
    %37 = vector.shape_cast %36 : vector<1x8x1x16xf32> to vector<8x16xf32>
    %c0_51 = arith.constant 0 : index
    %c217 = arith.constant 217 : index
    %38 = vector.load %arg9[%c0_51, %c217] : memref<8x326xf32, #tpu.memory_space<vmem>>, vector<8x16xf32>
    tpu.vector_store %arg9[%c0_51, %c217], %37 {strides = array<i32>} : memref<8x326xf32, #tpu.memory_space<vmem>>, vector<8x16xf32>,
    %c0_52 = arith.constant 0 : index
    %c0_53 = arith.constant 0 : index
    %c12 = arith.constant 12 : index
    %c0_54 = arith.constant 0 : index
    %39 = vector.load %arg1[%c0_52, %c0_53, %c12, %c0_54] : memref<1x8x16x16xf32, #tpu.memory_space<vmem>>, vector<1x8x1x16xf32>
    %40 = vector.shape_cast %39 : vector<1x8x1x16xf32> to vector<8x16xf32>
    %c0_55 = arith.constant 0 : index
    %c235 = arith.constant 235 : index
    %41 = vector.load %arg9[%c0_55, %c235] : memref<8x326xf32, #tpu.memory_space<vmem>>, vector<8x16xf32>
    tpu.vector_store %arg9[%c0_55, %c235], %40 {strides = array<i32>} : memref<8x326xf32, #tpu.memory_space<vmem>>, vector<8x16xf32>,
    %c0_56 = arith.constant 0 : index
    %c0_57 = arith.constant 0 : index
    %c13 = arith.constant 13 : index
    %c0_58 = arith.constant 0 : index
    %42 = vector.load %arg1[%c0_56, %c0_57, %c13, %c0_58] : memref<1x8x16x16xf32, #tpu.memory_space<vmem>>, vector<1x8x1x16xf32>
    %43 = vector.shape_cast %42 : vector<1x8x1x16xf32> to vector<8x16xf32>
    %c0_59 = arith.constant 0 : index
    %c253 = arith.constant 253 : index
    %44 = vector.load %arg9[%c0_59, %c253] : memref<8x326xf32, #tpu.memory_space<vmem>>, vector<8x16xf32>
    tpu.vector_store %arg9[%c0_59, %c253], %43 {strides = array<i32>} : memref<8x326xf32, #tpu.memory_space<vmem>>, vector<8x16xf32>,
    %c0_60 = arith.constant 0 : index
    %c0_61 = arith.constant 0 : index
    %c14 = arith.constant 14 : index
    %c0_62 = arith.constant 0 : index
    %45 = vector.load %arg1[%c0_60, %c0_61, %c14, %c0_62] : memref<1x8x16x16xf32, #tpu.memory_space<vmem>>, vector<1x8x1x16xf32>
    %46 = vector.shape_cast %45 : vector<1x8x1x16xf32> to vector<8x16xf32>
    %c0_63 = arith.constant 0 : index
    %c271 = arith.constant 271 : index
    %47 = vector.load %arg9[%c0_63, %c271] : memref<8x326xf32, #tpu.memory_space<vmem>>, vector<8x16xf32>
    tpu.vector_store %arg9[%c0_63, %c271], %46 {strides = array<i32>} : memref<8x326xf32, #tpu.memory_space<vmem>>, vector<8x16xf32>,
    %c0_64 = arith.constant 0 : index
    %c0_65 = arith.constant 0 : index
    %c15 = arith.constant 15 : index
    %c0_66 = arith.constant 0 : index
    %48 = vector.load %arg1[%c0_64, %c0_65, %c15, %c0_66] : memref<1x8x16x16xf32, #tpu.memory_space<vmem>>, vector<1x8x1x16xf32>
    %49 = vector.shape_cast %48 : vector<1x8x1x16xf32> to vector<8x16xf32>
    %c0_67 = arith.constant 0 : index
    %c289 = arith.constant 289 : index
    %50 = vector.load %arg9[%c0_67, %c289] : memref<8x326xf32, #tpu.memory_space<vmem>>, vector<8x16xf32>
    tpu.vector_store %arg9[%c0_67, %c289], %49 {strides = array<i32>} : memref<8x326xf32, #tpu.memory_space<vmem>>, vector<8x16xf32>,
    %c0_68 = arith.constant 0 : index
    %c0_69 = arith.constant 0 : index
    %51 = vector.load %arg9[%c0_68, %c0_69] : memref<8x326xf32, #tpu.memory_space<vmem>>, vector<8x326xf32>
    %c0_70 = arith.constant 0 : index
    %c0_71 = arith.constant 0 : index
    %52 = vector.load %arg3[%c0_70, %c0_71] : memref<4x72xf32, #tpu.memory_space<vmem>>, vector<4x72xf32>
    %53 = vector.extract_strided_slice %51 {offsets = [0, 0], sizes = [8, 288], strides = [1, 1]} : vector<8x326xf32> to vector<8x288xf32>
    %54 = vector.extract_strided_slice %51 {offsets = [0, 1], sizes = [8, 288], strides = [1, 1]} : vector<8x326xf32> to vector<8x288xf32>
    %55 = vector.extract_strided_slice %51 {offsets = [0, 2], sizes = [8, 288], strides = [1, 1]} : vector<8x326xf32> to vector<8x288xf32>
    %56 = vector.extract_strided_slice %51 {offsets = [0, 18], sizes = [8, 288], strides = [1, 1]} : vector<8x326xf32> to vector<8x288xf32>
    %57 = vector.extract_strided_slice %51 {offsets = [0, 19], sizes = [8, 288], strides = [1, 1]} : vector<8x326xf32> to vector<8x288xf32>
    %58 = vector.extract_strided_slice %51 {offsets = [0, 20], sizes = [8, 288], strides = [1, 1]} : vector<8x326xf32> to vector<8x288xf32>
    %59 = vector.extract_strided_slice %51 {offsets = [0, 36], sizes = [8, 288], strides = [1, 1]} : vector<8x326xf32> to vector<8x288xf32>
    %60 = vector.extract_strided_slice %51 {offsets = [0, 37], sizes = [8, 288], strides = [1, 1]} : vector<8x326xf32> to vector<8x288xf32>
    %61 = vector.extract_strided_slice %51 {offsets = [0, 38], sizes = [8, 288], strides = [1, 1]} : vector<8x326xf32> to vector<8x288xf32>
    %62 = tpu.concatenate %53, %54, %55, %56, %57, %58, %59, %60, %61 in 0 : vector<8x288xf32>, vector<8x288xf32>, vector<8x288xf32>, vector<8x288xf32>, vector<8x288xf32>, vector<8x288xf32>, vector<8x288xf32>, vector<8x288xf32>, vector<8x288xf32> -> vector<72x288xf32>
    %cst_72 = arith.constant dense<0.000000e+00> : vector<4x288xf32>
    %63 = tpu.matmul %52, %62, %cst_72 {dimension_numbers = #tpu.dot_dimension_numbers<[1], [0], [0], [1], [0, 0, 1, 1], [], []>} : vector<4x72xf32>, vector<72x288xf32>, vector<4x288xf32> -> vector<4x288xf32>
    %64 = vector.broadcast %0 : vector<1x288xf32> to vector<4x288xf32>
    %65 = arith.mulf %63, %64 : vector<4x288xf32>
    %cst_73 = arith.constant 0.000000e+00 : f32
    %66 = vector.broadcast %cst_73 : f32 to vector<4x288xf32>
    %67 = arith.cmpf oge, %65, %66 : vector<4x288xf32>
    %cst_74 = arith.constant 2.000000e-01 : f32
    %68 = vector.broadcast %cst_74 : f32 to vector<4x288xf32>
    %69 = arith.mulf %65, %68 : vector<4x288xf32>
    %70 = arith.select %67, %65, %69 : vector<4x288xi1>, vector<4x288xf32>
    %cst_75 = arith.constant 0.000000e+00 : f32
    %71 = vector.broadcast %cst_75 : f32 to vector<4x19xf32>
    %72 = tpu.concatenate %71, %70, %71 in 1 : vector<4x19xf32>, vector<4x288xf32>, vector<4x19xf32> -> vector<4x326xf32>
    %c0_76 = arith.constant 0 : index
    %c0_77 = arith.constant 0 : index
    %73 = vector.load %arg4[%c0_76, %c0_77] : memref<8x36xf32, #tpu.memory_space<vmem>>, vector<8x36xf32>
    %74 = vector.extract_strided_slice %72 {offsets = [0, 0], sizes = [4, 288], strides = [1, 1]} : vector<4x326xf32> to vector<4x288xf32>
    %75 = vector.extract_strided_slice %72 {offsets = [0, 1], sizes = [4, 288], strides = [1, 1]} : vector<4x326xf32> to vector<4x288xf32>
    %76 = vector.extract_strided_slice %72 {offsets = [0, 2], sizes = [4, 288], strides = [1, 1]} : vector<4x326xf32> to vector<4x288xf32>
    %77 = vector.extract_strided_slice %72 {offsets = [0, 18], sizes = [4, 288], strides = [1, 1]} : vector<4x326xf32> to vector<4x288xf32>
    %78 = vector.extract_strided_slice %72 {offsets = [0, 19], sizes = [4, 288], strides = [1, 1]} : vector<4x326xf32> to vector<4x288xf32>
    %79 = vector.extract_strided_slice %72 {offsets = [0, 20], sizes = [4, 288], strides = [1, 1]} : vector<4x326xf32> to vector<4x288xf32>
    %80 = vector.extract_strided_slice %72 {offsets = [0, 36], sizes = [4, 288], strides = [1, 1]} : vector<4x326xf32> to vector<4x288xf32>
    %81 = vector.extract_strided_slice %72 {offsets = [0, 37], sizes = [4, 288], strides = [1, 1]} : vector<4x326xf32> to vector<4x288xf32>
    %82 = vector.extract_strided_slice %72 {offsets = [0, 38], sizes = [4, 288], strides = [1, 1]} : vector<4x326xf32> to vector<4x288xf32>
    %83 = tpu.concatenate %74, %75, %76, %77, %78, %79, %80, %81, %82 in 0 : vector<4x288xf32>, vector<4x288xf32>, vector<4x288xf32>, vector<4x288xf32>, vector<4x288xf32>, vector<4x288xf32>, vector<4x288xf32>, vector<4x288xf32>, vector<4x288xf32> -> vector<36x288xf32>
    %cst_78 = arith.constant dense<0.000000e+00> : vector<8x288xf32>
    %84 = tpu.matmul %73, %83, %cst_78 {dimension_numbers = #tpu.dot_dimension_numbers<[1], [0], [0], [1], [0, 0, 1, 1], [], []>} : vector<8x36xf32>, vector<36x288xf32>, vector<8x288xf32> -> vector<8x288xf32>
    %85 = vector.broadcast %0 : vector<1x288xf32> to vector<8x288xf32>
    %86 = arith.mulf %84, %85 : vector<8x288xf32>
    %cst_79 = arith.constant 0.000000e+00 : f32
    %87 = vector.broadcast %cst_79 : f32 to vector<8x288xf32>
    %88 = arith.cmpf oge, %86, %87 : vector<8x288xf32>
    %cst_80 = arith.constant 2.000000e-01 : f32
    %89 = vector.broadcast %cst_80 : f32 to vector<8x288xf32>
    %90 = arith.mulf %86, %89 : vector<8x288xf32>
    %91 = arith.select %88, %86, %90 : vector<8x288xi1>, vector<8x288xf32>
    %cst_81 = arith.constant 0.000000e+00 : f32
    %92 = vector.broadcast %cst_81 : f32 to vector<8x19xf32>
    %93 = tpu.concatenate %92, %91, %92 in 1 : vector<8x19xf32>, vector<8x288xf32>, vector<8x19xf32> -> vector<8x326xf32>
    %c0_82 = arith.constant 0 : index
    %c0_83 = arith.constant 0 : index
    %94 = vector.load %arg5[%c0_82, %c0_83] : memref<4x72xf32, #tpu.memory_space<vmem>>, vector<4x72xf32>
    %95 = vector.extract_strided_slice %93 {offsets = [0, 0], sizes = [8, 288], strides = [1, 1]} : vector<8x326xf32> to vector<8x288xf32>
    %96 = vector.extract_strided_slice %93 {offsets = [0, 1], sizes = [8, 288], strides = [1, 1]} : vector<8x326xf32> to vector<8x288xf32>
    %97 = vector.extract_strided_slice %93 {offsets = [0, 2], sizes = [8, 288], strides = [1, 1]} : vector<8x326xf32> to vector<8x288xf32>
    %98 = vector.extract_strided_slice %93 {offsets = [0, 18], sizes = [8, 288], strides = [1, 1]} : vector<8x326xf32> to vector<8x288xf32>
    %99 = vector.extract_strided_slice %93 {offsets = [0, 19], sizes = [8, 288], strides = [1, 1]} : vector<8x326xf32> to vector<8x288xf32>
    %100 = vector.extract_strided_slice %93 {offsets = [0, 20], sizes = [8, 288], strides = [1, 1]} : vector<8x326xf32> to vector<8x288xf32>
    %101 = vector.extract_strided_slice %93 {offsets = [0, 36], sizes = [8, 288], strides = [1, 1]} : vector<8x326xf32> to vector<8x288xf32>
    %102 = vector.extract_strided_slice %93 {offsets = [0, 37], sizes = [8, 288], strides = [1, 1]} : vector<8x326xf32> to vector<8x288xf32>
    %103 = vector.extract_strided_slice %93 {offsets = [0, 38], sizes = [8, 288], strides = [1, 1]} : vector<8x326xf32> to vector<8x288xf32>
    %104 = tpu.concatenate %95, %96, %97, %98, %99, %100, %101, %102, %103 in 0 : vector<8x288xf32>, vector<8x288xf32>, vector<8x288xf32>, vector<8x288xf32>, vector<8x288xf32>, vector<8x288xf32>, vector<8x288xf32>, vector<8x288xf32>, vector<8x288xf32> -> vector<72x288xf32>
    %cst_84 = arith.constant dense<0.000000e+00> : vector<4x288xf32>
    %105 = tpu.matmul %94, %104, %cst_84 {dimension_numbers = #tpu.dot_dimension_numbers<[1], [0], [0], [1], [0, 0, 1, 1], [], []>} : vector<4x72xf32>, vector<72x288xf32>, vector<4x288xf32> -> vector<4x288xf32>
    %106 = vector.broadcast %0 : vector<1x288xf32> to vector<4x288xf32>
    %107 = arith.mulf %105, %106 : vector<4x288xf32>
    %cst_85 = arith.constant 0.000000e+00 : f32
    %108 = vector.broadcast %cst_85 : f32 to vector<4x326xf32>
    %c0_86 = arith.constant 0 : index
    %c0_87 = arith.constant 0 : index
    %109 = vector.load %arg10[%c0_86, %c0_87] : memref<4x326xf32, #tpu.memory_space<vmem>>, vector<4x326xf32>
    tpu.vector_store %arg10[%c0_86, %c0_87], %108 {strides = array<i32>} : memref<4x326xf32, #tpu.memory_space<vmem>>, vector<4x326xf32>,
    %c0_88 = arith.constant 0 : index
    %c0_89 = arith.constant 0 : index
    %c0_90 = arith.constant 0 : index
    %c0_91 = arith.constant 0 : index
    %110 = vector.load %arg2[%c0_88, %c0_89, %c0_90, %c0_91] : memref<1x4x16x16xf32, #tpu.memory_space<vmem>>, vector<1x4x1x16xf32>
    %111 = vector.shape_cast %110 : vector<1x4x1x16xf32> to vector<4x16xf32>
    %c0_92 = arith.constant 0 : index
    %c19_93 = arith.constant 19 : index
    %112 = vector.load %arg10[%c0_92, %c19_93] : memref<4x326xf32, #tpu.memory_space<vmem>>, vector<4x16xf32>
    tpu.vector_store %arg10[%c0_92, %c19_93], %111 {strides = array<i32>} : memref<4x326xf32, #tpu.memory_space<vmem>>, vector<4x16xf32>,
    %c0_94 = arith.constant 0 : index
    %c0_95 = arith.constant 0 : index
    %c1_96 = arith.constant 1 : index
    %c0_97 = arith.constant 0 : index
    %113 = vector.load %arg2[%c0_94, %c0_95, %c1_96, %c0_97] : memref<1x4x16x16xf32, #tpu.memory_space<vmem>>, vector<1x4x1x16xf32>
    %114 = vector.shape_cast %113 : vector<1x4x1x16xf32> to vector<4x16xf32>
    %c0_98 = arith.constant 0 : index
    %c37_99 = arith.constant 37 : index
    %115 = vector.load %arg10[%c0_98, %c37_99] : memref<4x326xf32, #tpu.memory_space<vmem>>, vector<4x16xf32>
    tpu.vector_store %arg10[%c0_98, %c37_99], %114 {strides = array<i32>} : memref<4x326xf32, #tpu.memory_space<vmem>>, vector<4x16xf32>,
    %c0_100 = arith.constant 0 : index
    %c0_101 = arith.constant 0 : index
    %c2_102 = arith.constant 2 : index
    %c0_103 = arith.constant 0 : index
    %116 = vector.load %arg2[%c0_100, %c0_101, %c2_102, %c0_103] : memref<1x4x16x16xf32, #tpu.memory_space<vmem>>, vector<1x4x1x16xf32>
    %117 = vector.shape_cast %116 : vector<1x4x1x16xf32> to vector<4x16xf32>
    %c0_104 = arith.constant 0 : index
    %c55_105 = arith.constant 55 : index
    %118 = vector.load %arg10[%c0_104, %c55_105] : memref<4x326xf32, #tpu.memory_space<vmem>>, vector<4x16xf32>
    tpu.vector_store %arg10[%c0_104, %c55_105], %117 {strides = array<i32>} : memref<4x326xf32, #tpu.memory_space<vmem>>, vector<4x16xf32>,
    %c0_106 = arith.constant 0 : index
    %c0_107 = arith.constant 0 : index
    %c3_108 = arith.constant 3 : index
    %c0_109 = arith.constant 0 : index
    %119 = vector.load %arg2[%c0_106, %c0_107, %c3_108, %c0_109] : memref<1x4x16x16xf32, #tpu.memory_space<vmem>>, vector<1x4x1x16xf32>
    %120 = vector.shape_cast %119 : vector<1x4x1x16xf32> to vector<4x16xf32>
    %c0_110 = arith.constant 0 : index
    %c73_111 = arith.constant 73 : index
    %121 = vector.load %arg10[%c0_110, %c73_111] : memref<4x326xf32, #tpu.memory_space<vmem>>, vector<4x16xf32>
    tpu.vector_store %arg10[%c0_110, %c73_111], %120 {strides = array<i32>} : memref<4x326xf32, #tpu.memory_space<vmem>>, vector<4x16xf32>,
    %c0_112 = arith.constant 0 : index
    %c0_113 = arith.constant 0 : index
    %c4_114 = arith.constant 4 : index
    %c0_115 = arith.constant 0 : index
    %122 = vector.load %arg2[%c0_112, %c0_113, %c4_114, %c0_115] : memref<1x4x16x16xf32, #tpu.memory_space<vmem>>, vector<1x4x1x16xf32>
    %123 = vector.shape_cast %122 : vector<1x4x1x16xf32> to vector<4x16xf32>
    %c0_116 = arith.constant 0 : index
    %c91_117 = arith.constant 91 : index
    %124 = vector.load %arg10[%c0_116, %c91_117] : memref<4x326xf32, #tpu.memory_space<vmem>>, vector<4x16xf32>
    tpu.vector_store %arg10[%c0_116, %c91_117], %123 {strides = array<i32>} : memref<4x326xf32, #tpu.memory_space<vmem>>, vector<4x16xf32>,
    %c0_118 = arith.constant 0 : index
    %c0_119 = arith.constant 0 : index
    %c5_120 = arith.constant 5 : index
    %c0_121 = arith.constant 0 : index
    %125 = vector.load %arg2[%c0_118, %c0_119, %c5_120, %c0_121] : memref<1x4x16x16xf32, #tpu.memory_space<vmem>>, vector<1x4x1x16xf32>
    %126 = vector.shape_cast %125 : vector<1x4x1x16xf32> to vector<4x16xf32>
    %c0_122 = arith.constant 0 : index
    %c109_123 = arith.constant 109 : index
    %127 = vector.load %arg10[%c0_122, %c109_123] : memref<4x326xf32, #tpu.memory_space<vmem>>, vector<4x16xf32>
    tpu.vector_store %arg10[%c0_122, %c109_123], %126 {strides = array<i32>} : memref<4x326xf32, #tpu.memory_space<vmem>>, vector<4x16xf32>,
    %c0_124 = arith.constant 0 : index
    %c0_125 = arith.constant 0 : index
    %c6_126 = arith.constant 6 : index
    %c0_127 = arith.constant 0 : index
    %128 = vector.load %arg2[%c0_124, %c0_125, %c6_126, %c0_127] : memref<1x4x16x16xf32, #tpu.memory_space<vmem>>, vector<1x4x1x16xf32>
    %129 = vector.shape_cast %128 : vector<1x4x1x16xf32> to vector<4x16xf32>
    %c0_128 = arith.constant 0 : index
    %c127_129 = arith.constant 127 : index
    %130 = vector.load %arg10[%c0_128, %c127_129] : memref<4x326xf32, #tpu.memory_space<vmem>>, vector<4x16xf32>
    tpu.vector_store %arg10[%c0_128, %c127_129], %129 {strides = array<i32>} : memref<4x326xf32, #tpu.memory_space<vmem>>, vector<4x16xf32>,
    %c0_130 = arith.constant 0 : index
    %c0_131 = arith.constant 0 : index
    %c7_132 = arith.constant 7 : index
    %c0_133 = arith.constant 0 : index
    %131 = vector.load %arg2[%c0_130, %c0_131, %c7_132, %c0_133] : memref<1x4x16x16xf32, #tpu.memory_space<vmem>>, vector<1x4x1x16xf32>
    %132 = vector.shape_cast %131 : vector<1x4x1x16xf32> to vector<4x16xf32>
    %c0_134 = arith.constant 0 : index
    %c145_135 = arith.constant 145 : index
    %133 = vector.load %arg10[%c0_134, %c145_135] : memref<4x326xf32, #tpu.memory_space<vmem>>, vector<4x16xf32>
    tpu.vector_store %arg10[%c0_134, %c145_135], %132 {strides = array<i32>} : memref<4x326xf32, #tpu.memory_space<vmem>>, vector<4x16xf32>,
    %c0_136 = arith.constant 0 : index
    %c0_137 = arith.constant 0 : index
    %c8_138 = arith.constant 8 : index
    %c0_139 = arith.constant 0 : index
    %134 = vector.load %arg2[%c0_136, %c0_137, %c8_138, %c0_139] : memref<1x4x16x16xf32, #tpu.memory_space<vmem>>, vector<1x4x1x16xf32>
    %135 = vector.shape_cast %134 : vector<1x4x1x16xf32> to vector<4x16xf32>
    %c0_140 = arith.constant 0 : index
    %c163_141 = arith.constant 163 : index
    %136 = vector.load %arg10[%c0_140, %c163_141] : memref<4x326xf32, #tpu.memory_space<vmem>>, vector<4x16xf32>
    tpu.vector_store %arg10[%c0_140, %c163_141], %135 {strides = array<i32>} : memref<4x326xf32, #tpu.memory_space<vmem>>, vector<4x16xf32>,
    %c0_142 = arith.constant 0 : index
    %c0_143 = arith.constant 0 : index
    %c9_144 = arith.constant 9 : index
    %c0_145 = arith.constant 0 : index
    %137 = vector.load %arg2[%c0_142, %c0_143, %c9_144, %c0_145] : memref<1x4x16x16xf32, #tpu.memory_space<vmem>>, vector<1x4x1x16xf32>
    %138 = vector.shape_cast %137 : vector<1x4x1x16xf32> to vector<4x16xf32>
    %c0_146 = arith.constant 0 : index
    %c181_147 = arith.constant 181 : index
    %139 = vector.load %arg10[%c0_146, %c181_147] : memref<4x326xf32, #tpu.memory_space<vmem>>, vector<4x16xf32>
    tpu.vector_store %arg10[%c0_146, %c181_147], %138 {strides = array<i32>} : memref<4x326xf32, #tpu.memory_space<vmem>>, vector<4x16xf32>,
    %c0_148 = arith.constant 0 : index
    %c0_149 = arith.constant 0 : index
    %c10_150 = arith.constant 10 : index
    %c0_151 = arith.constant 0 : index
    %140 = vector.load %arg2[%c0_148, %c0_149, %c10_150, %c0_151] : memref<1x4x16x16xf32, #tpu.memory_space<vmem>>, vector<1x4x1x16xf32>
    %141 = vector.shape_cast %140 : vector<1x4x1x16xf32> to vector<4x16xf32>
    %c0_152 = arith.constant 0 : index
    %c199_153 = arith.constant 199 : index
    %142 = vector.load %arg10[%c0_152, %c199_153] : memref<4x326xf32, #tpu.memory_space<vmem>>, vector<4x16xf32>
    tpu.vector_store %arg10[%c0_152, %c199_153], %141 {strides = array<i32>} : memref<4x326xf32, #tpu.memory_space<vmem>>, vector<4x16xf32>,
    %c0_154 = arith.constant 0 : index
    %c0_155 = arith.constant 0 : index
    %c11_156 = arith.constant 11 : index
    %c0_157 = arith.constant 0 : index
    %143 = vector.load %arg2[%c0_154, %c0_155, %c11_156, %c0_157] : memref<1x4x16x16xf32, #tpu.memory_space<vmem>>, vector<1x4x1x16xf32>
    %144 = vector.shape_cast %143 : vector<1x4x1x16xf32> to vector<4x16xf32>
    %c0_158 = arith.constant 0 : index
    %c217_159 = arith.constant 217 : index
    %145 = vector.load %arg10[%c0_158, %c217_159] : memref<4x326xf32, #tpu.memory_space<vmem>>, vector<4x16xf32>
    tpu.vector_store %arg10[%c0_158, %c217_159], %144 {strides = array<i32>} : memref<4x326xf32, #tpu.memory_space<vmem>>, vector<4x16xf32>,
    %c0_160 = arith.constant 0 : index
    %c0_161 = arith.constant 0 : index
    %c12_162 = arith.constant 12 : index
    %c0_163 = arith.constant 0 : index
    %146 = vector.load %arg2[%c0_160, %c0_161, %c12_162, %c0_163] : memref<1x4x16x16xf32, #tpu.memory_space<vmem>>, vector<1x4x1x16xf32>
    %147 = vector.shape_cast %146 : vector<1x4x1x16xf32> to vector<4x16xf32>
    %c0_164 = arith.constant 0 : index
    %c235_165 = arith.constant 235 : index
    %148 = vector.load %arg10[%c0_164, %c235_165] : memref<4x326xf32, #tpu.memory_space<vmem>>, vector<4x16xf32>
    tpu.vector_store %arg10[%c0_164, %c235_165], %147 {strides = array<i32>} : memref<4x326xf32, #tpu.memory_space<vmem>>, vector<4x16xf32>,
    %c0_166 = arith.constant 0 : index
    %c0_167 = arith.constant 0 : index
    %c13_168 = arith.constant 13 : index
    %c0_169 = arith.constant 0 : index
    %149 = vector.load %arg2[%c0_166, %c0_167, %c13_168, %c0_169] : memref<1x4x16x16xf32, #tpu.memory_space<vmem>>, vector<1x4x1x16xf32>
    %150 = vector.shape_cast %149 : vector<1x4x1x16xf32> to vector<4x16xf32>
    %c0_170 = arith.constant 0 : index
    %c253_171 = arith.constant 253 : index
    %151 = vector.load %arg10[%c0_170, %c253_171] : memref<4x326xf32, #tpu.memory_space<vmem>>, vector<4x16xf32>
    tpu.vector_store %arg10[%c0_170, %c253_171], %150 {strides = array<i32>} : memref<4x326xf32, #tpu.memory_space<vmem>>, vector<4x16xf32>,
    %c0_172 = arith.constant 0 : index
    %c0_173 = arith.constant 0 : index
    %c14_174 = arith.constant 14 : index
    %c0_175 = arith.constant 0 : index
    %152 = vector.load %arg2[%c0_172, %c0_173, %c14_174, %c0_175] : memref<1x4x16x16xf32, #tpu.memory_space<vmem>>, vector<1x4x1x16xf32>
    %153 = vector.shape_cast %152 : vector<1x4x1x16xf32> to vector<4x16xf32>
    %c0_176 = arith.constant 0 : index
    %c271_177 = arith.constant 271 : index
    %154 = vector.load %arg10[%c0_176, %c271_177] : memref<4x326xf32, #tpu.memory_space<vmem>>, vector<4x16xf32>
    tpu.vector_store %arg10[%c0_176, %c271_177], %153 {strides = array<i32>} : memref<4x326xf32, #tpu.memory_space<vmem>>, vector<4x16xf32>,
    %c0_178 = arith.constant 0 : index
    %c0_179 = arith.constant 0 : index
    %c15_180 = arith.constant 15 : index
    %c0_181 = arith.constant 0 : index
    %155 = vector.load %arg2[%c0_178, %c0_179, %c15_180, %c0_181] : memref<1x4x16x16xf32, #tpu.memory_space<vmem>>, vector<1x4x1x16xf32>
    %156 = vector.shape_cast %155 : vector<1x4x1x16xf32> to vector<4x16xf32>
    %c0_182 = arith.constant 0 : index
    %c289_183 = arith.constant 289 : index
    %157 = vector.load %arg10[%c0_182, %c289_183] : memref<4x326xf32, #tpu.memory_space<vmem>>, vector<4x16xf32>
    tpu.vector_store %arg10[%c0_182, %c289_183], %156 {strides = array<i32>} : memref<4x326xf32, #tpu.memory_space<vmem>>, vector<4x16xf32>,
    %c0_184 = arith.constant 0 : index
    %c0_185 = arith.constant 0 : index
    %158 = vector.load %arg10[%c0_184, %c0_185] : memref<4x326xf32, #tpu.memory_space<vmem>>, vector<4x326xf32>
    %cst_186 = arith.constant 0.000000e+00 : f32
    %159 = vector.broadcast %cst_186 : f32 to vector<4x19xf32>
    %160 = tpu.concatenate %159, %107, %159 in 1 : vector<4x19xf32>, vector<4x288xf32>, vector<4x19xf32> -> vector<4x326xf32>
    %161 = tpu.concatenate %160, %158 in 0 : vector<4x326xf32>, vector<4x326xf32> -> vector<8x326xf32>
    %c0_187 = arith.constant 0 : index
    %c0_188 = arith.constant 0 : index
    %162 = vector.load %arg6[%c0_187, %c0_188] : memref<4x72xf32, #tpu.memory_space<vmem>>, vector<4x72xf32>
    %163 = vector.extract_strided_slice %161 {offsets = [0, 0], sizes = [8, 288], strides = [1, 1]} : vector<8x326xf32> to vector<8x288xf32>
    %164 = vector.extract_strided_slice %161 {offsets = [0, 1], sizes = [8, 288], strides = [1, 1]} : vector<8x326xf32> to vector<8x288xf32>
    %165 = vector.extract_strided_slice %161 {offsets = [0, 2], sizes = [8, 288], strides = [1, 1]} : vector<8x326xf32> to vector<8x288xf32>
    %166 = vector.extract_strided_slice %161 {offsets = [0, 18], sizes = [8, 288], strides = [1, 1]} : vector<8x326xf32> to vector<8x288xf32>
    %167 = vector.extract_strided_slice %161 {offsets = [0, 19], sizes = [8, 288], strides = [1, 1]} : vector<8x326xf32> to vector<8x288xf32>
    %168 = vector.extract_strided_slice %161 {offsets = [0, 20], sizes = [8, 288], strides = [1, 1]} : vector<8x326xf32> to vector<8x288xf32>
    %169 = vector.extract_strided_slice %161 {offsets = [0, 36], sizes = [8, 288], strides = [1, 1]} : vector<8x326xf32> to vector<8x288xf32>
    %170 = vector.extract_strided_slice %161 {offsets = [0, 37], sizes = [8, 288], strides = [1, 1]} : vector<8x326xf32> to vector<8x288xf32>
    %171 = vector.extract_strided_slice %161 {offsets = [0, 38], sizes = [8, 288], strides = [1, 1]} : vector<8x326xf32> to vector<8x288xf32>
    %172 = tpu.concatenate %163, %164, %165, %166, %167, %168, %169, %170, %171 in 0 : vector<8x288xf32>, vector<8x288xf32>, vector<8x288xf32>, vector<8x288xf32>, vector<8x288xf32>, vector<8x288xf32>, vector<8x288xf32>, vector<8x288xf32>, vector<8x288xf32> -> vector<72x288xf32>
    %cst_189 = arith.constant dense<0.000000e+00> : vector<4x288xf32>
    %173 = tpu.matmul %162, %172, %cst_189 {dimension_numbers = #tpu.dot_dimension_numbers<[1], [0], [0], [1], [0, 0, 1, 1], [], []>} : vector<4x72xf32>, vector<72x288xf32>, vector<4x288xf32> -> vector<4x288xf32>
    %c0_190 = arith.constant 0 : index
    %c0_191 = arith.constant 0 : index
    %c0_192 = arith.constant 0 : index
    %174 = vector.load %arg8[%c0_190, %c0_191, %c0_192] : memref<1x4x288xf32, #tpu.memory_space<vmem>>, vector<1x4x288xf32>
    %175 = vector.shape_cast %174 : vector<1x4x288xf32> to vector<4x288xf32>
    %176 = vector.shape_cast %173 : vector<4x288xf32> to vector<1x4x288xf32>
    tpu.vector_store %arg8[%c0_190, %c0_191, %c0_192], %176 {strides = array<i32>} : memref<1x4x288xf32, #tpu.memory_space<vmem>>, vector<1x4x288xf32>,
    return
  }
  func.func @transform_0(%arg0: i32) -> (i32, i32, i32, i32) {
    %c0_i32 = arith.constant 0 : i32
    %c0_i32_0 = arith.constant 0 : i32
    %c0_i32_1 = arith.constant 0 : i32
    %c0_i32_2 = arith.constant 0 : i32
    return %arg0, %c0_i32, %c0_i32_0, %c0_i32_1 : i32, i32, i32, i32
  }
  func.func @transform_1(%arg0: i32) -> (i32, i32, i32, i32) {
    %c0_i32 = arith.constant 0 : i32
    %c0_i32_0 = arith.constant 0 : i32
    %c0_i32_1 = arith.constant 0 : i32
    %c0_i32_2 = arith.constant 0 : i32
    return %arg0, %c0_i32, %c0_i32_0, %c0_i32_1 : i32, i32, i32, i32
  }
  func.func @transform_2(%arg0: i32) -> (i32, i32) {
    %c0_i32 = arith.constant 0 : i32
    %c0_i32_0 = arith.constant 0 : i32
    %c0_i32_1 = arith.constant 0 : i32
    return %c0_i32, %c0_i32_0 : i32, i32
  }
  func.func @transform_3(%arg0: i32) -> (i32, i32) {
    %c0_i32 = arith.constant 0 : i32
    %c0_i32_0 = arith.constant 0 : i32
    %c0_i32_1 = arith.constant 0 : i32
    return %c0_i32, %c0_i32_0 : i32, i32
  }
  func.func @transform_4(%arg0: i32) -> (i32, i32) {
    %c0_i32 = arith.constant 0 : i32
    %c0_i32_0 = arith.constant 0 : i32
    %c0_i32_1 = arith.constant 0 : i32
    return %c0_i32, %c0_i32_0 : i32, i32
  }
  func.func @transform_5(%arg0: i32) -> (i32, i32) {
    %c0_i32 = arith.constant 0 : i32
    %c0_i32_0 = arith.constant 0 : i32
    %c0_i32_1 = arith.constant 0 : i32
    return %c0_i32, %c0_i32_0 : i32, i32
  }
  func.func @transform_6(%arg0: i32) -> (i32, i32) {
    %c0_i32 = arith.constant 0 : i32
    %c0_i32_0 = arith.constant 0 : i32
    %c0_i32_1 = arith.constant 0 : i32
    return %c0_i32, %c0_i32_0 : i32, i32
  }
  func.func @transform_7(%arg0: i32) -> (i32, i32, i32) {
    %c0_i32 = arith.constant 0 : i32
    %c0_i32_0 = arith.constant 0 : i32
    %c0_i32_1 = arith.constant 0 : i32
    return %arg0, %c0_i32, %c0_i32_0 : i32, i32, i32
  }
}

</mosaic_0001>

<bundles_post_ra>
// kernel: unet_up_1_forward.1
= control target key start
LH: loop header
LB: loop body
LE: loop exit
PB: predicated region body
PF: predicated region fallthrough
CT: control target
= control target key end

     0   :  { %s2882_s24 = smov 0   ;;  %s3609_s0 = inlined_call_operand.vmem [shape: f32[2,8,16,16], index: 0, kind: input, shape index: {}]   ;;  %s3610_s1 = inlined_call_operand.vmem [shape: f32[2,4,16,16], index: 1, kind: input, shape index: {}]   ;;  %s3611_s2 = inlined_call_operand.vmem [shape: f32[4,72], index: 2, kind: input, shape index: {}]   ;;  %s3612_s3 = inlined_call_operand.vmem [shape: f32[8,36], index: 3, kind: input, shape index: {}]   ;;  %s3613_s4 = inlined_call_operand.vmem [shape: f32[4,72], index: 4, kind: input, shape index: {}]   ;;  %s3614_s5 = inlined_call_operand.vmem [shape: f32[4,72], index: 5, kind: input, shape index: {}]   ;;  %s3615_s6 = inlined_call_operand.vmem [shape: f32[1,288], index: 6, kind: input, shape index: {}]   ;;  %s3616_s7 = inlined_call_operand.vmem [shape: f32[2,4,288], index: 7, kind: output, shape index: {}]  }
   0x1 LB: > { %s2391_s25 = sadd.s32 4294967295, %s2815_s24   ;;  %p2395_p0 = scmp.ge.s32.totalorder %s2815_s24, 1  ;;  %s2815_s24 = sphi %s2882_s24, %s17_s24  }
   0x2   : > { %p247_p1 = scmp.lt.s32.totalorder %s2815_s24, 3 }
   0x4   : > { %p248_p2 = pnand %p2395_p0, %p247_p1 }
   0x5   : > { %p284_p3 = scmp.lt.s32.totalorder (!%p248_p2), %s2391_s25, 1  ;;  %v2817_v0 = vmov (!%p248_p2), 0.0   ;;  %vm321_vm0 = vcmask (!%p248_p2), 1041409   ;;  %vm3623_vm1 = vcmask (!%p248_p2), 1042434   ;;  %vm3621_vm2 = vcmask (!%p248_p2), 1043459   ;;  %s2818_s30 = smov (!%p248_p2), 127  }
   0x6   : > { %251 = sbr.rel (%p248_p2) target bundleno = 2035 (0x7f3), region = 48  ;;  %301 = vst [vmem:[#allocation2 + $0x8] sm:$0xff] (!%p248_p2), %v2817_v0  ;;  %300 = vst [vmem:[#allocation2] sm:$0xff] (!%p248_p2), %v2817_v0  ;;  %1046 = vmatprep.mubr.f32.mxu0 (!%p248_p2), %v2817_v0  ;;  %vm330_vm3 = vcmask (!%p248_p2), 1044484   ;;  %vm333_vm4 = vcmask (!%p248_p2), 1045509   ;;  %vm3622_vm5 = vcmask (!%p248_p2), 1046534  }
   0x7   : > { %1690 = vst [vmem:[#allocation3] sm:$0xff] (!%p248_p2), %v2817_v0  ;;  %vm3620_vm6 = vcmask (!%p248_p2), 1047559   ;;  %s2819_s8 = smov (!%p248_p2), 19   ;;  %s2820_s9 = smov (!%p248_p2), 17   ;;  %vm302_vm7 = vcmask (!%p248_p2), 572416   ;;  %vm556_vm8 = vcmask (!%p248_p2), 121856  }
   0x8   : > { %s2821_s10 = smov (!%p248_p2), 35   ;;  %s2822_s11 = smov (!%p248_p2), 37   ;;  %303 = vst.msk [vmem:[#allocation2 + $0x10] sm:$0xff] (!%p248_p2), %vm302_vm7, %v2817_v0  ;;  %vm344_vm9 = vcmask (!%p248_p2), 285848   ;;  %vm591_vm10 = vcmask (!%p248_p2), 269448   ;;  %vm626_vm11 = vcmask (!%p248_p2), 417048  }
   0x9   : > { %s2823_s12 = smov (!%p248_p2), 53   ;;  %s2824_s13 = smov (!%p248_p2), 55   ;;  %vm379_vm12 = vcmask (!%p248_p2), 433448   ;;  %vm661_vm13 = vcmask (!%p248_p2), 564648   ;;  %vm414_vm14 = vcmask (!%p248_p2), 581048   ;;  %vm696_vm15 = vcmask (!%p248_p2), 712248  }
   0xa   : > { %s2825_s14 = smov (!%p248_p2), 71   ;;  %s2826_s15 = smov (!%p248_p2), 73   ;;  %vm731_vm7 = vcmask (!%p248_p2), 859848  }
   0xb   : > { %s3626_s16 = smov (!%p248_p2), 89   ;;  %s2828_s17 = smov (!%p248_p2), 125  }
   0xc   : > { %s2829_s18 = smov (!%p248_p2), 91   ;;  %s3625_s19 = smov (!%p248_p2), 107  }
   0xd   : > { %s3691_s25 = smov (!%p284_p3, %s2391_s25), 1  ;;  %s3618_s20 = smov 15  }
   0xe   : > { %s2417_s26 = sshll.u32 %s3691_s25, 7  ;;  %s2832_s21 = smov 109  }
   0xf   : > { %s2900_s29 = scalar_lea.vmem %s3609_s0, %s2417_s26  ;;  %s3617_s22 = smov 33  }
  0x10   : > { %v521_v1 = vld [vmem:[%s2900_s29 + $0x6] sm:$0x1]  ;;  %v522_v2 = vld [vmem:[%s2900_s29 + $0x16] sm:$0x1]  ;;  %v304_v14 = vld [vmem:[%s2900_s29] sm:$0x1] }
  0x11   : > { %v523_v3 = vld [vmem:[%s2900_s29 + $0x26] sm:$0x1]  ;;  %v524_v4 = vld [vmem:[%s2900_s29 + $0x36] sm:$0x1]  ;;  %v537_v9 = vrot.slane %v522_v2, 7  ;;  %s2834_s23 = smov 126  }
  0x12   : > { %v525_v5 = vld [vmem:[%s2900_s29 + $0x46] sm:$0x1]  ;;  %v526_v6 = vld [vmem:[%s2900_s29 + $0x56] sm:$0x1]  ;;  %v539_v10 = vrot.slane %v523_v3, 6  ;;  %v541_v11 = vrot.slane %v524_v4, 5 }
  0x13   : > { %v527_v7 = vld [vmem:[%s2900_s29 + $0x66] sm:$0x1]  ;;  %v528_v8 = vld [vmem:[%s2900_s29 + $0x76] sm:$0x1]  ;;  %v543_v12 = vrot.slane %v525_v5, 4  ;;  %v545_v13 = vrot.slane %v526_v6, 3  ;;  %v538_v15 = vsel %vm321_vm0, %v537_v9, %v521_v1 }
  0x14   : > { %v547_v16 = vrot.slane %v527_v7, 2  ;;  %v549_v17 = vrot.slane %v528_v8, 1  ;;  %v305_v18 = vld [vmem:[%s2900_s29 + $0x10] sm:$0x1]  ;;  %v306_v19 = vld [vmem:[%s2900_s29 + $0x20] sm:$0x1]  ;;  %v540_v20 = vsel %vm3623_vm1, %v539_v10, %v538_v15 }
  0x15   : > { %v307_v21 = vld [vmem:[%s2900_s29 + $0x30] sm:$0x1]  ;;  %v308_v22 = vld [vmem:[%s2900_s29 + $0x40] sm:$0x1]  ;;  %v542_v24 = vsel %vm3621_vm2, %v541_v11, %v540_v20  ;;  %v320_v27 = vrot.slane %v305_v18, 7  ;;  %v323_v28 = vrot.slane %v306_v19, 6 }
  0x16   : > { %v309_v23 = vld [vmem:[%s2900_s29 + $0x50] sm:$0x1]  ;;  %v310_v25 = vld [vmem:[%s2900_s29 + $0x60] sm:$0x1]  ;;  %v544_v29 = vsel %vm330_vm3, %v543_v12, %v542_v24  ;;  %v326_v30 = vrot.slane %v307_v21, 5  ;;  %v329_v31 = vrot.slane %v308_v22, 4 }
  0x17   : > { %v311_v26 = vld [vmem:[%s2900_s29 + $0x70] sm:$0x1]  ;;  %v332_v32 = vrot.slane %v309_v23, 3  ;;  %v558_v33 = vld [vmem:[%s2900_s29 + $0x7] sm:$0x1]  ;;  %v546_v34 = vsel %vm333_vm4, %v545_v13, %v544_v29  ;;  %v322_v35 = vsel %vm321_vm0, %v320_v27, %v304_v14  ;;  %v335_v36 = vrot.slane %v310_v25, 2 }
  0x18   : > { %v338_v37 = vrot.slane %v311_v26, 1  ;;  %v559_v38 = vld [vmem:[%s2900_s29 + $0x17] sm:$0x1]  ;;  %v560_v39 = vld [vmem:[%s2900_s29 + $0x27] sm:$0x1]  ;;  %v548_v40 = vsel %vm3622_vm5, %v547_v16, %v546_v34  ;;  %v325_v41 = vsel %vm3623_vm1, %v323_v28, %v322_v35  ;;  %s2836_s26 = smov 110  }
  0x19   : > { %v561_v42 = vld [vmem:[%s2900_s29 + $0x37] sm:$0x1]  ;;  %v562_v43 = vld [vmem:[%s2900_s29 + $0x47] sm:$0x1]  ;;  %v550_v45 = vsel %vm3620_vm6, %v549_v17, %v548_v40  ;;  %v328_v46 = vsel %vm3621_vm2, %v326_v30, %v325_v41  ;;  %v574_v49 = vrot.slane %v559_v38, 7  ;;  %v576_v50 = vrot.slane %v560_v39, 6 }
  0x1a   : > { %v563_v44 = vld [vmem:[%s2900_s29 + $0x57] sm:$0x1]  ;;  %v564_v47 = vld [vmem:[%s2900_s29 + $0x67] sm:$0x1]  ;;  %551 = vrot.lane.b32.xlu0 %v550_v45, %s2818_s30  ;;  %v331_v51 = vsel %vm330_vm3, %v329_v31, %v328_v46  ;;  %v578_v52 = vrot.slane %v561_v42, 5  ;;  %v580_v53 = vrot.slane %v562_v43, 4 }
  0x1b   : > { %v565_v48 = vld [vmem:[%s2900_s29 + $0x77] sm:$0x1]  ;;  %v582_v54 = vrot.slane %v563_v44, 3  ;;  %v593_v55 = vld [vmem:[%s2900_s29 + $0x8] sm:$0x1]  ;;  %v334_v56 = vsel %vm333_vm4, %v332_v32, %v331_v51  ;;  %v575_v57 = vsel %vm321_vm0, %v574_v49, %v558_v33  ;;  %v584_v58 = vrot.slane %v564_v47, 2 }
  0x1c   : > { %v586_v59 = vrot.slane %v565_v48, 1  ;;  %v594_v60 = vld [vmem:[%s2900_s29 + $0x18] sm:$0x1]  ;;  %v595_v61 = vld [vmem:[%s2900_s29 + $0x28] sm:$0x1]  ;;  %v337_v62 = vsel %vm3622_vm5, %v335_v36, %v334_v56  ;;  %v577_v63 = vsel %vm3623_vm1, %v576_v50, %v575_v57  ;;  %s2837_s27 = smov 92  }
  0x1d   : > { %v596_v1 = vld [vmem:[%s2900_s29 + $0x38] sm:$0x1]  ;;  %v597_v2 = vld [vmem:[%s2900_s29 + $0x48] sm:$0x1]  ;;  %v340_v4 = vsel %vm3620_vm6, %v338_v37, %v337_v62  ;;  %v579_v5 = vsel %vm3621_vm2, %v578_v52, %v577_v63  ;;  %v609_v8 = vrot.slane %v594_v60, 7  ;;  %v611_v9 = vrot.slane %v595_v61, 6 }
  0x1e   : > { %v598_v3 = vld [vmem:[%s2900_s29 + $0x58] sm:$0x1]  ;;  %v599_v6 = vld [vmem:[%s2900_s29 + $0x68] sm:$0x1]  ;;  %341 = vrot.lane.b32.xlu1 %v340_v4, %s2819_s8  ;;  %v581_v10 = vsel %vm330_vm3, %v580_v53, %v579_v5  ;;  %v613_v11 = vrot.slane %v596_v1, 5  ;;  %v615_v12 = vrot.slane %v597_v2, 4 }
  0x1f   : > { %v600_v7 = vld [vmem:[%s2900_s29 + $0x78] sm:$0x1]  ;;  %v617_v13 = vrot.slane %v598_v3, 3  ;;  %v346_v14 = vld [vmem:[%s2900_s29 + $0x1] sm:$0x1]  ;;  %v583_v15 = vsel %vm333_vm4, %v582_v54, %v581_v10  ;;  %v610_v16 = vsel %vm321_vm0, %v609_v8, %v593_v55  ;;  %v619_v17 = vrot.slane %v599_v6, 2 }
  0x20   : > { %v621_v18 = vrot.slane %v600_v7, 1  ;;  %v347_v19 = vld [vmem:[%s2900_s29 + $0x11] sm:$0x1]  ;;  %v348_v20 = vld [vmem:[%s2900_s29 + $0x21] sm:$0x1]  ;;  %v585_v21 = vsel %vm3622_vm5, %v584_v58, %v583_v15  ;;  %v612_v22 = vsel %vm3623_vm1, %v611_v9, %v610_v16  ;;  %s2838_s28 = smov 108  }
  0x21   : > { %v349_v23 = vld [vmem:[%s2900_s29 + $0x31] sm:$0x1]  ;;  %v350_v24 = vld [vmem:[%s2900_s29 + $0x41] sm:$0x1]  ;;  %v587_v26 = vsel %vm3620_vm6, %v586_v59, %v585_v21  ;;  %v614_v27 = vsel %vm3621_vm2, %v613_v11, %v612_v22  ;;  %v362_v30 = vrot.slane %v347_v19, 7  ;;  %v364_v31 = vrot.slane %v348_v20, 6 }
  0x22   : > { %v351_v25 = vld [vmem:[%s2900_s29 + $0x51] sm:$0x1]  ;;  %v352_v28 = vld [vmem:[%s2900_s29 + $0x61] sm:$0x1]  ;;  %588 = vrot.lane.b32.xlu0 %v587_v26, %s2820_s9  ;;  %v616_v32 = vsel %vm330_vm3, %v615_v12, %v614_v27  ;;  %v366_v33 = vrot.slane %v349_v23, 5  ;;  %v368_v34 = vrot.slane %v350_v24, 4 }
  0x23   : > { %v353_v29 = vld [vmem:[%s2900_s29 + $0x71] sm:$0x1]  ;;  %v370_v35 = vrot.slane %v351_v25, 3  ;;  %v628_v36 = vld [vmem:[%s2900_s29 + $0x9] sm:$0x1]  ;;  %v618_v37 = vsel %vm333_vm4, %v617_v13, %v616_v32  ;;  %v363_v38 = vsel %vm321_vm0, %v362_v30, %v346_v14  ;;  %v372_v39 = vrot.slane %v352_v28, 2 }
  0x24   : > { %v374_v40 = vrot.slane %v353_v29, 1  ;;  %v629_v41 = vld [vmem:[%s2900_s29 + $0x19] sm:$0x1]  ;;  %v630_v42 = vld [vmem:[%s2900_s29 + $0x29] sm:$0x1]  ;;  %v620_v43 = vsel %vm3622_vm5, %v619_v17, %v618_v37  ;;  %v365_v44 = vsel %vm3623_vm1, %v364_v31, %v363_v38 }
  0x25   : > { %v631_v45 = vld [vmem:[%s2900_s29 + $0x39] sm:$0x1]  ;;  %v632_v46 = vld [vmem:[%s2900_s29 + $0x49] sm:$0x1]  ;;  %v622_v48 = vsel %vm3620_vm6, %v621_v18, %v620_v43  ;;  %v367_v49 = vsel %vm3621_vm2, %v366_v33, %v365_v44  ;;  %v644_v52 = vrot.slane %v629_v41, 7  ;;  %v646_v53 = vrot.slane %v630_v42, 6 }
  0x26   : > { %v633_v47 = vld [vmem:[%s2900_s29 + $0x59] sm:$0x1]  ;;  %v634_v50 = vld [vmem:[%s2900_s29 + $0x69] sm:$0x1]  ;;  %623 = vrot.lane.b32.xlu1 %v622_v48, %s2821_s10  ;;  %v369_v54 = vsel %vm330_vm3, %v368_v34, %v367_v49  ;;  %v648_v55 = vrot.slane %v631_v45, 5  ;;  %v650_v56 = vrot.slane %v632_v46, 4 }
  0x27   : > { %v635_v51 = vld [vmem:[%s2900_s29 + $0x79] sm:$0x1]  ;;  %v652_v57 = vrot.slane %v633_v47, 3  ;;  %v381_v58 = vld [vmem:[%s2900_s29 + $0x2] sm:$0x1]  ;;  %v371_v59 = vsel %vm333_vm4, %v370_v35, %v369_v54  ;;  %v645_v60 = vsel %vm321_vm0, %v644_v52, %v628_v36  ;;  %v654_v61 = vrot.slane %v634_v50, 2 }
  0x28   : > { %v656_v62 = vrot.slane %v635_v51, 1  ;;  %v382_v63 = vld [vmem:[%s2900_s29 + $0x12] sm:$0x1]  ;;  %v383_v1 = vld [vmem:[%s2900_s29 + $0x22] sm:$0x1]  ;;  %v373_v2 = vsel %vm3622_vm5, %v372_v39, %v371_v59  ;;  %v647_v3 = vsel %vm3623_vm1, %v646_v53, %v645_v60 }
  0x29   : > { %v384_v4 = vld [vmem:[%s2900_s29 + $0x32] sm:$0x1]  ;;  %v385_v5 = vld [vmem:[%s2900_s29 + $0x42] sm:$0x1]  ;;  %v375_v7 = vsel %vm3620_vm6, %v374_v40, %v373_v2  ;;  %v649_v8 = vsel %vm3621_vm2, %v648_v55, %v647_v3  ;;  %v397_v11 = vrot.slane %v382_v63, 7  ;;  %v399_v12 = vrot.slane %v383_v1, 6 }
  0x2a   : > { %v386_v6 = vld [vmem:[%s2900_s29 + $0x52] sm:$0x1]  ;;  %v387_v9 = vld [vmem:[%s2900_s29 + $0x62] sm:$0x1]  ;;  %376 = vrot.lane.b32.xlu0 %v375_v7, %s2822_s11  ;;  %v651_v13 = vsel %vm330_vm3, %v650_v56, %v649_v8  ;;  %v401_v14 = vrot.slane %v384_v4, 5  ;;  %v403_v15 = vrot.slane %v385_v5, 4 }
  0x2b   : > { %v388_v10 = vld [vmem:[%s2900_s29 + $0x72] sm:$0x1]  ;;  %v405_v16 = vrot.slane %v386_v6, 3  ;;  %v663_v17 = vld [vmem:[%s2900_s29 + $0xa] sm:$0x1]  ;;  %v653_v18 = vsel %vm333_vm4, %v652_v57, %v651_v13  ;;  %v398_v19 = vsel %vm321_vm0, %v397_v11, %v381_v58  ;;  %v407_v20 = vrot.slane %v387_v9, 2 }
  0x2c   : > { %v409_v21 = vrot.slane %v388_v10, 1  ;;  %v664_v22 = vld [vmem:[%s2900_s29 + $0x1a] sm:$0x1]  ;;  %v665_v23 = vld [vmem:[%s2900_s29 + $0x2a] sm:$0x1]  ;;  %v655_v24 = vsel %vm3622_vm5, %v654_v61, %v653_v18  ;;  %v400_v25 = vsel %vm3623_vm1, %v399_v12, %v398_v19 }
  0x2d   : > { %v666_v26 = vld [vmem:[%s2900_s29 + $0x3a] sm:$0x1]  ;;  %v667_v27 = vld [vmem:[%s2900_s29 + $0x4a] sm:$0x1]  ;;  %v657_v29 = vsel %vm3620_vm6, %v656_v62, %v655_v24  ;;  %v402_v30 = vsel %vm3621_vm2, %v401_v14, %v400_v25  ;;  %v679_v33 = vrot.slane %v664_v22, 7  ;;  %v681_v34 = vrot.slane %v665_v23, 6 }
  0x2e   : > { %v668_v28 = vld [vmem:[%s2900_s29 + $0x5a] sm:$0x1]  ;;  %v669_v31 = vld [vmem:[%s2900_s29 + $0x6a] sm:$0x1]  ;;  %658 = vrot.lane.b32.xlu1 %v657_v29, %s2823_s12  ;;  %v404_v35 = vsel %vm330_vm3, %v403_v15, %v402_v30  ;;  %v683_v36 = vrot.slane %v666_v26, 5  ;;  %v685_v37 = vrot.slane %v667_v27, 4 }
  0x2f   : > { %v670_v32 = vld [vmem:[%s2900_s29 + $0x7a] sm:$0x1]  ;;  %v687_v38 = vrot.slane %v668_v28, 3  ;;  %v416_v39 = vld [vmem:[%s2900_s29 + $0x3] sm:$0x1]  ;;  %v406_v40 = vsel %vm333_vm4, %v405_v16, %v404_v35  ;;  %v680_v41 = vsel %vm321_vm0, %v679_v33, %v663_v17  ;;  %v689_v42 = vrot.slane %v669_v31, 2 }
  0x30   : > { %v691_v43 = vrot.slane %v670_v32, 1  ;;  %v417_v44 = vld [vmem:[%s2900_s29 + $0x13] sm:$0x1]  ;;  %v418_v45 = vld [vmem:[%s2900_s29 + $0x23] sm:$0x1]  ;;  %v408_v46 = vsel %vm3622_vm5, %v407_v20, %v406_v40  ;;  %v682_v47 = vsel %vm3623_vm1, %v681_v34, %v680_v41 }
  0x31   : > { %v419_v48 = vld [vmem:[%s2900_s29 + $0x33] sm:$0x1]  ;;  %v420_v49 = vld [vmem:[%s2900_s29 + $0x43] sm:$0x1]  ;;  %v410_v51 = vsel %vm3620_vm6, %v409_v21, %v408_v46  ;;  %v684_v52 = vsel %vm3621_vm2, %v683_v36, %v682_v47  ;;  %v432_v55 = vrot.slane %v417_v44, 7  ;;  %v434_v56 = vrot.slane %v418_v45, 6 }
  0x32   : > { %v421_v50 = vld [vmem:[%s2900_s29 + $0x53] sm:$0x1]  ;;  %v422_v53 = vld [vmem:[%s2900_s29 + $0x63] sm:$0x1]  ;;  %411 = vrot.lane.b32.xlu0 %v410_v51, %s2824_s13  ;;  %v686_v57 = vsel %vm330_vm3, %v685_v37, %v684_v52  ;;  %v436_v58 = vrot.slane %v419_v48, 5  ;;  %v438_v59 = vrot.slane %v420_v49, 4 }
  0x33   : > { %v423_v54 = vld [vmem:[%s2900_s29 + $0x73] sm:$0x1]  ;;  %v440_v60 = vrot.slane %v421_v50, 3  ;;  %v698_v61 = vld [vmem:[%s2900_s29 + $0xb] sm:$0x1]  ;;  %v688_v62 = vsel %vm333_vm4, %v687_v38, %v686_v57  ;;  %v433_v63 = vsel %vm321_vm0, %v432_v55, %v416_v39  ;;  %v442_v1 = vrot.slane %v422_v53, 2 }
  0x34   : > { %v444_v2 = vrot.slane %v423_v54, 1  ;;  %v699_v3 = vld [vmem:[%s2900_s29 + $0x1b] sm:$0x1]  ;;  %v700_v4 = vld [vmem:[%s2900_s29 + $0x2b] sm:$0x1]  ;;  %v690_v5 = vsel %vm3622_vm5, %v689_v42, %v688_v62  ;;  %v435_v6 = vsel %vm3623_vm1, %v434_v56, %v433_v63 }
  0x35   : > { %v701_v7 = vld [vmem:[%s2900_s29 + $0x3b] sm:$0x1]  ;;  %v702_v8 = vld [vmem:[%s2900_s29 + $0x4b] sm:$0x1]  ;;  %v692_v10 = vsel %vm3620_vm6, %v691_v43, %v690_v5  ;;  %v437_v11 = vsel %vm3621_vm2, %v436_v58, %v435_v6  ;;  %v714_v14 = vrot.slane %v699_v3, 7  ;;  %v716_v15 = vrot.slane %v700_v4, 6 }
  0x36   : > { %v703_v9 = vld [vmem:[%s2900_s29 + $0x5b] sm:$0x1]  ;;  %v704_v12 = vld [vmem:[%s2900_s29 + $0x6b] sm:$0x1]  ;;  %693 = vrot.lane.b32.xlu1 %v692_v10, %s2825_s14  ;;  %v439_v16 = vsel %vm330_vm3, %v438_v59, %v437_v11  ;;  %v718_v17 = vrot.slane %v701_v7, 5  ;;  %v720_v18 = vrot.slane %v702_v8, 4 }
  0x37   : > { %v705_v13 = vld [vmem:[%s2900_s29 + $0x7b] sm:$0x1]  ;;  %v722_v19 = vrot.slane %v703_v9, 3  ;;  %v768_v20 = vld [vmem:[%s2900_s29 + $0xd] sm:$0x1]  ;;  %v441_v21 = vsel %vm333_vm4, %v440_v60, %v439_v16  ;;  %v715_v22 = vsel %vm321_vm0, %v714_v14, %v698_v61  ;;  %v724_v23 = vrot.slane %v704_v12, 2 }
  0x38   : > { %v726_v24 = vrot.slane %v705_v13, 1  ;;  %v769_v25 = vld [vmem:[%s2900_s29 + $0x1d] sm:$0x1]  ;;  %v770_v26 = vld [vmem:[%s2900_s29 + $0x2d] sm:$0x1]  ;;  %v443_v27 = vsel %vm3622_vm5, %v442_v1, %v441_v21  ;;  %v717_v28 = vsel %vm3623_vm1, %v716_v15, %v715_v22 }
  0x39   : > { %v771_v29 = vld [vmem:[%s2900_s29 + $0x3d] sm:$0x1]  ;;  %v772_v30 = vld [vmem:[%s2900_s29 + $0x4d] sm:$0x1]  ;;  %v445_v32 = vsel %vm3620_vm6, %v444_v2, %v443_v27  ;;  %v719_v33 = vsel %vm3621_vm2, %v718_v17, %v717_v28  ;;  %v784_v36 = vrot.slane %v769_v25, 7  ;;  %v786_v37 = vrot.slane %v770_v26, 6 }
  0x3a   : > { %v773_v31 = vld [vmem:[%s2900_s29 + $0x5d] sm:$0x1]  ;;  %v774_v34 = vld [vmem:[%s2900_s29 + $0x6d] sm:$0x1]  ;;  %446 = vrot.lane.b32.xlu0 %v445_v32, %s2826_s15  ;;  %v721_v38 = vsel %vm330_vm3, %v720_v18, %v719_v33  ;;  %v788_v39 = vrot.slane %v771_v29, 5  ;;  %v790_v40 = vrot.slane %v772_v30, 4 }
  0x3b   : > { %v775_v35 = vld [vmem:[%s2900_s29 + $0x7d] sm:$0x1]  ;;  %v792_v41 = vrot.slane %v773_v31, 3  ;;  %v451_v42 = vld [vmem:[%s2900_s29 + $0x4] sm:$0x1]  ;;  %v723_v43 = vsel %vm333_vm4, %v722_v19, %v721_v38  ;;  %v785_v44 = vsel %vm321_vm0, %v784_v36, %v768_v20  ;;  %v794_v45 = vrot.slane %v774_v34, 2 }
  0x3c   : > { %v796_v46 = vrot.slane %v775_v35, 1  ;;  %v452_v47 = vld [vmem:[%s2900_s29 + $0x14] sm:$0x1]  ;;  %v453_v48 = vld [vmem:[%s2900_s29 + $0x24] sm:$0x1]  ;;  %v725_v49 = vsel %vm3622_vm5, %v724_v23, %v723_v43  ;;  %v787_v50 = vsel %vm3623_vm1, %v786_v37, %v785_v44 }
  0x3d   : > { %v454_v51 = vld [vmem:[%s2900_s29 + $0x34] sm:$0x1]  ;;  %v455_v52 = vld [vmem:[%s2900_s29 + $0x44] sm:$0x1]  ;;  %v727_v54 = vsel %vm3620_vm6, %v726_v24, %v725_v49  ;;  %v789_v55 = vsel %vm3621_vm2, %v788_v39, %v787_v50  ;;  %v467_v58 = vrot.slane %v452_v47, 7  ;;  %v469_v59 = vrot.slane %v453_v48, 6 }
  0x3e   : > { %v456_v53 = vld [vmem:[%s2900_s29 + $0x54] sm:$0x1]  ;;  %v457_v56 = vld [vmem:[%s2900_s29 + $0x64] sm:$0x1]  ;;  %728 = vrot.lane.b32.xlu1 %v727_v54, %s3626_s16  ;;  %v791_v60 = vsel %vm330_vm3, %v790_v40, %v789_v55  ;;  %v471_v61 = vrot.slane %v454_v51, 5  ;;  %v473_v62 = vrot.slane %v455_v52, 4 }
  0x3f   : > { %v458_v57 = vld [vmem:[%s2900_s29 + $0x74] sm:$0x1]  ;;  %v475_v63 = vrot.slane %v456_v53, 3  ;;  %v733_v1 = vld [vmem:[%s2900_s29 + $0xc] sm:$0x1]  ;;  %v793_v2 = vsel %vm333_vm4, %v792_v41, %v791_v60  ;;  %v468_v3 = vsel %vm321_vm0, %v467_v58, %v451_v42  ;;  %v477_v4 = vrot.slane %v457_v56, 2 }
  0x40   : > { %v479_v5 = vrot.slane %v458_v57, 1  ;;  %v734_v6 = vld [vmem:[%s2900_s29 + $0x1c] sm:$0x1]  ;;  %v735_v7 = vld [vmem:[%s2900_s29 + $0x2c] sm:$0x1]  ;;  %v795_v8 = vsel %vm3622_vm5, %v794_v45, %v793_v2  ;;  %v470_v9 = vsel %vm3623_vm1, %v469_v59, %v468_v3 }
  0x41   : > { %v736_v10 = vld [vmem:[%s2900_s29 + $0x3c] sm:$0x1]  ;;  %v737_v11 = vld [vmem:[%s2900_s29 + $0x4c] sm:$0x1]  ;;  %v797_v13 = vsel %vm3620_vm6, %v796_v46, %v795_v8  ;;  %v472_v14 = vsel %vm3621_vm2, %v471_v61, %v470_v9  ;;  %v749_v17 = vrot.slane %v734_v6, 7  ;;  %v751_v18 = vrot.slane %v735_v7, 6 }
  0x42   : > { %v738_v12 = vld [vmem:[%s2900_s29 + $0x5c] sm:$0x1]  ;;  %v739_v15 = vld [vmem:[%s2900_s29 + $0x6c] sm:$0x1]  ;;  %798 = vrot.lane.b32.xlu0 %v797_v13, %s2828_s17  ;;  %v474_v19 = vsel %vm330_vm3, %v473_v62, %v472_v14  ;;  %v753_v20 = vrot.slane %v736_v10, 5  ;;  %v755_v21 = vrot.slane %v737_v11, 4 }
  0x43   : > { %v740_v16 = vld [vmem:[%s2900_s29 + $0x7c] sm:$0x1]  ;;  %v757_v22 = vrot.slane %v738_v12, 3  ;;  %v805_v23 = vld [vmem:[%s2900_s29 + $0xe] sm:$0x1]  ;;  %v476_v24 = vsel %vm333_vm4, %v475_v63, %v474_v19  ;;  %v750_v25 = vsel %vm321_vm0, %v749_v17, %v733_v1  ;;  %v759_v26 = vrot.slane %v739_v15, 2 }
  0x44   : > { %v761_v27 = vrot.slane %v740_v16, 1  ;;  %v806_v28 = vld [vmem:[%s2900_s29 + $0x1e] sm:$0x1]  ;;  %v807_v29 = vld [vmem:[%s2900_s29 + $0x2e] sm:$0x1]  ;;  %v478_v30 = vsel %vm3622_vm5, %v477_v4, %v476_v24  ;;  %v752_v31 = vsel %vm3623_vm1, %v751_v18, %v750_v25 }
  0x45   : > { %v808_v32 = vld [vmem:[%s2900_s29 + $0x3e] sm:$0x1]  ;;  %v809_v33 = vld [vmem:[%s2900_s29 + $0x4e] sm:$0x1]  ;;  %v480_v35 = vsel %vm3620_vm6, %v479_v5, %v478_v30  ;;  %v754_v36 = vsel %vm3621_vm2, %v753_v20, %v752_v31  ;;  %v821_v39 = vrot.slane %v806_v28, 7  ;;  %v823_v40 = vrot.slane %v807_v29, 6 }
  0x46   : > { %v810_v34 = vld [vmem:[%s2900_s29 + $0x5e] sm:$0x1]  ;;  %v811_v37 = vld [vmem:[%s2900_s29 + $0x6e] sm:$0x1]  ;;  %481 = vrot.lane.b32.xlu1 %v480_v35, %s2829_s18  ;;  %v756_v41 = vsel %vm330_vm3, %v755_v21, %v754_v36  ;;  %v825_v42 = vrot.slane %v808_v32, 5  ;;  %v827_v43 = vrot.slane %v809_v33, 4 }
  0x47   : > { %v812_v38 = vld [vmem:[%s2900_s29 + $0x7e] sm:$0x1]  ;;  %v829_v44 = vrot.slane %v810_v34, 3  ;;  %v486_v45 = vld [vmem:[%s2900_s29 + $0x5] sm:$0x1]  ;;  %v758_v46 = vsel %vm333_vm4, %v757_v22, %v756_v41  ;;  %v822_v47 = vsel %vm321_vm0, %v821_v39, %v805_v23  ;;  %v831_v48 = vrot.slane %v811_v37, 2 }
  0x48   : > { %v833_v49 = vrot.slane %v812_v38, 1  ;;  %v487_v50 = vld [vmem:[%s2900_s29 + $0x15] sm:$0x1]  ;;  %v488_v51 = vld [vmem:[%s2900_s29 + $0x25] sm:$0x1]  ;;  %v760_v52 = vsel %vm3622_vm5, %v759_v26, %v758_v46  ;;  %v824_v53 = vsel %vm3623_vm1, %v823_v40, %v822_v47 }
  0x49   : > { %v489_v54 = vld [vmem:[%s2900_s29 + $0x35] sm:$0x1]  ;;  %v490_v55 = vld [vmem:[%s2900_s29 + $0x45] sm:$0x1]  ;;  %v762_v57 = vsel %vm3620_vm6, %v761_v27, %v760_v52  ;;  %v826_v58 = vsel %vm3621_vm2, %v825_v42, %v824_v53  ;;  %v502_v61 = vrot.slane %v487_v50, 7  ;;  %v504_v62 = vrot.slane %v488_v51, 6 }
  0x4a   : > { %v491_v56 = vld [vmem:[%s2900_s29 + $0x55] sm:$0x1]  ;;  %v492_v59 = vld [vmem:[%s2900_s29 + $0x65] sm:$0x1]  ;;  %763 = vrot.lane.b32.xlu0 %v762_v57, %s3625_s19  ;;  %v828_v63 = vsel %vm330_vm3, %v827_v43, %v826_v58  ;;  %v506_v1 = vrot.slane %v489_v54, 5  ;;  %v508_v2 = vrot.slane %v490_v55, 4 }
  0x4b   : > { %v493_v60 = vld [vmem:[%s2900_s29 + $0x75] sm:$0x1]  ;;  %v510_v3 = vrot.slane %v491_v56, 3  ;;  %v840_v4 = vld [vmem:[%s2900_s29 + $0xf] sm:$0x1]  ;;  %v830_v5 = vsel %vm333_vm4, %v829_v44, %v828_v63  ;;  %v503_v6 = vsel %vm321_vm0, %v502_v61, %v486_v45  ;;  %v512_v7 = vrot.slane %v492_v59, 2 }
  0x4c   : > { %v514_v8 = vrot.slane %v493_v60, 1  ;;  %v841_v9 = vld [vmem:[%s2900_s29 + $0x1f] sm:$0x1]  ;;  %v842_v10 = vld [vmem:[%s2900_s29 + $0x2f] sm:$0x1]  ;;  %v832_v11 = vsel %vm3622_vm5, %v831_v48, %v830_v5  ;;  %v505_v12 = vsel %vm3623_vm1, %v504_v62, %v503_v6  ;;  %v2835_v55 = vmov 0.0|0.0  }
  0x4d   : > { %v843_v13 = vld [vmem:[%s2900_s29 + $0x3f] sm:$0x1]  ;;  %v844_v14 = vld [vmem:[%s2900_s29 + $0x4f] sm:$0x1]  ;;  %v834_v16 = vsel %vm3620_vm6, %v833_v49, %v832_v11  ;;  %v507_v17 = vsel %vm3621_vm2, %v506_v1, %v505_v12  ;;  %v856_v19 = vrot.slane %v841_v9, 7  ;;  %v858_v20 = vrot.slane %v842_v10, 6  ;;  %2547 = vmatprep.subr.bf16.mxu1 %v2835_v55 }
  0x4e   : > { %v845_v15 = vld [vmem:[%s2900_s29 + $0x5f] sm:$0x1]  ;;  %v846_v18 = vld [vmem:[%s2900_s29 + $0x6f] sm:$0x1]  ;;  %835 = vrot.lane.b32.xlu1 %v834_v16, %s3618_s20  ;;  %v509_v21 = vsel %vm330_vm3, %v508_v2, %v507_v17  ;;  %v860_v23 = vrot.slane %v843_v13, 5  ;;  %v862_v24 = vrot.slane %v844_v14, 4 }
  0x4f   : > { %v847_v22 = vld [vmem:[%s2900_s29 + $0x7f] sm:$0x1]  ;;  %v511_v25 = vsel %vm333_vm4, %v510_v3, %v509_v21  ;;  %v857_v26 = vsel %vm321_vm0, %v856_v19, %v840_v4  ;;  %v864_v27 = vrot.slane %v845_v15, 3  ;;  %v866_v30 = vrot.slane %v846_v18, 2  ;;  %s2840_s29 = smov 90   ;;  %s2418_s20 = sshll.u32 %s3691_s25, 6 }
  0x50   : > { %v513_v28 = vsel %vm3622_vm5, %v512_v7, %v511_v25  ;;  %v859_v29 = vsel %vm3623_vm1, %v858_v20, %v857_v26  ;;  %v868_v33 = vrot.slane %v847_v22, 1  ;;  %vm1167_vm1 = vcmask 416768   ;;  %s3325_s16 = scalar_lea.vmem %s3610_s1, %s2418_s20 }
  0x51   : > { %v515_v31 = vsel %vm3620_vm6, %v514_v8, %v513_v28  ;;  %v861_v32 = vsel %vm3621_vm2, %v860_v23, %v859_v29 }
  0x52   : > { %516 = vrot.lane.b32.xlu0 %v515_v31, %s2832_s21  ;;  %v863_v34 = vsel %vm330_vm3, %v862_v24, %v861_v32  ;;  %vm449_vm3 = vcmask 728648  }
  0x53   : > { %v865_v35 = vsel %vm333_vm4, %v864_v27, %v863_v34 }
  0x54   : > { %v867_v36 = vsel %vm3622_vm5, %v866_v30, %v865_v35  ;;  %vm1160_vm5 = vcmask 154624  }
  0x55   : > { %v869_v37 = vsel %vm3620_vm6, %v868_v33, %v867_v36 }
  0x56   : > { %870 = vrot.lane.b32.xlu1 %v869_v37, %s3617_s22 }
  0x8c   : > { %v552_v38 = vpop.permute.xlu0 %551 }
  0x8d   : > { %557 = vst.msk [vmem:[#allocation2 + $0x8] sm:$0xff] %vm556_vm8, %v552_v38  ;;  %vm803_vm8 = vcmask 105472  }
  0x90   : > { %v342_v39 = vpop.permute.xlu1 %341 }
  0x91   : > { %345 = vst.msk [vmem:[#allocation2] sm:$0xff] %vm344_vm9, %v342_v39  ;;  %vm484_vm9 = vcmask 876248  }
  0x94   : > { %v589_v40 = vpop.permute.xlu0 %588 }
  0x95   : > { %592 = vst.msk [vmem:[#allocation2 + $0x8] sm:$0xff] %vm591_vm10, %v589_v40  ;;  %vm766_vm10 = vcmask 1007448  }
  0x98   : > { %v624_v41 = vpop.permute.xlu1 %623 }
  0x99   : > { %627 = vst.msk [vmem:[#allocation2 + $0x8] sm:$0xff] %vm626_vm11, %v624_v41  ;;  %vm801_vm11 = vcmask 1048552  }
  0x9c   : > { %v377_v42 = vpop.permute.xlu0 %376 }
  0x9d   : > { %380 = vst.msk [vmem:[#allocation2] sm:$0xff] %vm379_vm12, %v377_v42  ;;  %vm838_vm12 = vcmask 253048  }
  0xa0   : > { %v659_v43 = vpop.permute.xlu1 %658 }
  0xa1   : > { %662 = vst.msk [vmem:[#allocation2 + $0x8] sm:$0xff] %vm661_vm13, %v659_v43  ;;  %vm519_vm13 = vcmask 1023848  }
  0xa4   : > { %v412_v44 = vpop.permute.xlu0 %411 }
  0xa5   : > { %415 = vst.msk [vmem:[#allocation2] sm:$0xff] %vm414_vm14, %v412_v44  ;;  %vm554_vm14 = vcmask 1048568  }
  0xa8   : > { %v694_v45 = vpop.permute.xlu1 %693 }
  0xa9   : > { %697 = vst.msk [vmem:[#allocation2 + $0x8] sm:$0xff] %vm696_vm15, %v694_v45  ;;  %vm873_vm15 = vcmask 400648  }
  0xac   : > { %v447_v46 = vpop.permute.xlu0 %446 }
  0xad   : > { %450 = vst.msk [vmem:[#allocation2] sm:$0xff] %vm449_vm3, %v447_v46  ;;  %vm3627_vm3 = vmmov 0  }
  0xae   : > { %2473 = vmatprep.mubr.msk.f32.mxu1 %vm3627_vm3, %v2817_v0 }
  0xb0   : > { %v729_v47 = vpop.permute.xlu1 %728 }
  0xb1   : > { %732 = vst.msk [vmem:[#allocation2 + $0x8] sm:$0xff] %vm731_vm7, %v729_v47  ;;  %vm888_vm7 = vcmask 1039360  }
  0xb4   : > { %v799_v48 = vpop.permute.xlu0 %798 }
  0xb5   : > { %804 = vst.msk [vmem:[#allocation2 + $0x10] sm:$0xff] %vm803_vm8, %v799_v48  ;;  %vm912_vm8 = vcmask 900096  }
  0xb8   : > { %v482_v49 = vpop.permute.xlu1 %481 }
  0xb9   : > { %485 = vst.msk [vmem:[#allocation2] sm:$0xff] %vm484_vm9, %v482_v49  ;;  %vm900_vm9 = vcmask 1031168  }
  0xbc   : > { %v764_v50 = vpop.permute.xlu0 %763 }
  0xbd   : > { %767 = vst.msk [vmem:[#allocation2 + $0x8] sm:$0xff] %vm766_vm10, %v764_v50  ;;  %vm3632_vm10 = vcmask 883712  }
  0xbe   : > { %802 = vst.msk [vmem:[#allocation2 + $0x8] sm:$0xff] %vm801_vm11, %v799_v48  ;;  %vm3631_vm11 = vcmask 891904  }
  0xc0   : > { %v836_v51 = vpop.permute.xlu1 %835 }
  0xc1   : > { %839 = vst.msk [vmem:[#allocation2 + $0x10] sm:$0xff] %vm838_vm12, %v836_v51  ;;  %vm3630_vm12 = vcmask 744448   ;;  %v3199_v51 = vld [vmem:[#allocation3] sm:$0xff] }
  0xc4   : > { %v517_v52 = vpop.permute.xlu0 %516 }
  0xc5   : > { %520 = vst.msk [vmem:[#allocation2] sm:$0xff] %vm519_vm13, %v517_v52  ;;  %v876_v57 = vld [vmem:[#allocation2 + $0x8] sm:$0xff]  ;;  %vm3629_vm13 = vcmask 752640  }
  0xc6   : > { %555 = vst.msk [vmem:[#allocation2] sm:$0xff] %vm554_vm14, %v552_v38  ;;  %vm3628_vm14 = vcmask 736256  }
  0xc8   : > { %v871_v53 = vpop.permute.xlu1 %870 }
  0xc9   : > { %874 = vst.msk [vmem:[#allocation2 + $0x10] sm:$0xff] %vm873_vm15, %v871_v53  ;;  %v878_v53 = vld [vmem:[%s3611_s2] sm:$0xf]  ;;  %vm3619_vm15 = vcmask 588800  }
  0xcd   : > { %v875_v54 = vld [vmem:[#allocation2] sm:$0xff] }
  0xce   : > { %894 = vrot.lane.b32.xlu0 %v875_v54, %s2834_s23  ;;  %882 = vrot.lane.b32.xlu1 %v875_v54, %s2818_s30 }
  0xd0   : > { %v877_v56 = vld [vmem:[#allocation2 + $0x10] sm:$0xff] }
  0xd1   : > { %v2675_v58 = vpack.i.bf16 %v877_v56, %v876_v57 }
  0xd2   : > { %918 = vrot.lane.b32.xlu0 %v875_v54, %s2832_s21  ;;  %906 = vrot.lane.b32.xlu1 %v875_v54, %s2836_s26 }
  0xd6   : > { %942 = vrot.lane.b32.xlu0 %v875_v54, %s2837_s27  ;;  %930 = vrot.lane.b32.xlu1 %v875_v54, %s2838_s28 }
  0xda   : > { %2676 = vrot.lane.b32.xlu1 %v2675_v58, %s2836_s26  ;;  %2666 = vrot.lane.b32.xlu0 %v2675_v58, %s2818_s30 }
  0xde   : > { %2686 = vrot.lane.b32.xlu1 %v2675_v58, %s2838_s28  ;;  %2671 = vrot.lane.b32.xlu0 %v2675_v58, %s2834_s23 }
  0xe2   : > { %2696 = vrot.lane.b32.xlu1 %v2675_v58, %s2829_s18  ;;  %2681 = vrot.lane.b32.xlu0 %v2675_v58, %s2832_s21 }
  0xe6   : > { %954 = vrot.lane.b32.xlu1 %v875_v54, %s2829_s18  ;;  %2691 = vrot.lane.b32.xlu0 %v2675_v58, %s2837_s27 }
  0xea   : > { %970 = vrot.lane.b32.xlu1 %v877_v56, %s2840_s29  ;;  %968 = vrot.lane.b32.xlu0 %v876_v57, %s2840_s29 }
  0xee   : > { %966 = vrot.lane.b32.xlu0 %v875_v54, %s2840_s29 }
 0x140   : > { %v895_v59 = vpop.permute.xlu0 %894  ;;  %v883_v60 = vpop.permute.xlu1 %882 }
 0x144   : > { %v919_v61 = vpop.permute.xlu0 %918  ;;  %v907_v62 = vpop.permute.xlu1 %906 }
 0x148   : > { %v3179_v63 = vpop.permute.xlu0 %942  ;;  %v931_v1 = vpop.permute.xlu1 %930 }
 0x14c   : > { %v2667_v2 = vpop.permute.xlu0 %2666  ;;  %v2677_v0 = vpop.permute.xlu1 %2676 }
 0x14d   : > { %v2669_v3 = vunpack.i.h.bf16 %v2667_v2  ;;  %v2668_v4 = vunpack.i.l.bf16 %v2667_v2  ;;  %v2679_v5 = vunpack.i.h.bf16 %v2677_v0  ;;  %v2678_v6 = vunpack.i.l.bf16 %v2677_v0 }
 0x14f   : > { %v2548_v7 = vpack.c.bf16 %v2669_v3, %v877_v56  ;;  %v890_v8 = vsel %vm888_vm7, %v2668_v4, %v2669_v3  ;;  %v889_v9 = vsel %vm888_vm7, %v883_v60, %v2668_v4  ;;  %v914_v18 = vsel %vm912_vm8, %v2678_v6, %v2679_v5  ;;  %v299_v60 = vld [vmem:[%s3615_s6] sm:$0x7] }
 0x150   : > { %v2672_v10 = vpop.permute.xlu0 %2671  ;;  %v2687_v11 = vpop.permute.xlu1 %2686  ;;  %v2531_v12 = vpack.c.bf16 %v890_v8, %v876_v57  ;;  %v2533_v13 = vpack.c.bf16 %v889_v9, %v875_v54  ;;  %v913_v22 = vsel %vm912_vm8, %v907_v62, %v2678_v6  ;;  %v1124_v57 = vlaneseq }
 0x151   : > { %v2674_v14 = vunpack.i.h.bf16 %v2672_v10  ;;  %v2673_v15 = vunpack.i.l.bf16 %v2672_v10  ;;  %2549 = vmatpush3.bf16.msra.mxu1 %v2548_v7  ;;  %v2689_v16 = vunpack.i.h.bf16 %v2687_v11  ;;  %v2688_v17 = vunpack.i.l.bf16 %v2687_v11 }
 0x152   : > { %2532 = vmatprep.subr.bf16.mxu0 %v2531_v12  ;;  %2550 = vmatprep.subr.bf16.mxu1 %v2835_v55  ;;  %v1125_v58 = vshrl.u32 %v1124_v57, 7 }
 0x153   : > { %v2551_v19 = vpack.c.bf16 %v2679_v5, %v2674_v14  ;;  %2534 = vmatpush1.bf16.msra.mxu0 %v2533_v13  ;;  %v902_v20 = vsel %vm900_vm9, %v2673_v15, %v2674_v14  ;;  %v901_v21 = vsel %vm900_vm9, %v895_v59, %v2673_v15  ;;  %v938_v31 = vsel %vm3632_vm10, %v2688_v17, %v2689_v16 }
 0x154   : > { %v2682_v23 = vpop.permute.xlu0 %2681  ;;  %v2697_v24 = vpop.permute.xlu1 %2696  ;;  %v2535_v25 = vpack.c.bf16 %v914_v18, %v902_v20  ;;  %v2537_v26 = vpack.c.bf16 %v913_v22, %v901_v21  ;;  %v937_v35 = vsel %vm3632_vm10, %v931_v1, %v2688_v17  ;;  %v1134_v59 = vsub.s32 2, %v1125_v58 }
 0x155   : > { %v2684_v27 = vunpack.i.h.bf16 %v2682_v23  ;;  %v2683_v28 = vunpack.i.l.bf16 %v2682_v23  ;;  %2552 = vmatpush3.bf16.msra.mxu1 %v2551_v19  ;;  %v2699_v29 = vunpack.i.h.bf16 %v2697_v24  ;;  %v2698_v30 = vunpack.i.l.bf16 %v2697_v24 }
 0x156   : > { %2536 = vmatprep.subr.bf16.mxu0 %v2535_v25  ;;  %2553 = vmatprep.subr.bf16.mxu1 %v2835_v55  ;;  %v1130_v62 = vsub.s32 1, %v1125_v58 }
 0x157   : > { %v2554_v32 = vpack.c.bf16 %v2689_v16, %v2684_v27  ;;  %2538 = vmatpush1.bf16.msra.mxu0 %v2537_v26  ;;  %v926_v33 = vsel %vm3631_vm11, %v2683_v28, %v2684_v27  ;;  %v925_v34 = vsel %vm3631_vm11, %v919_v61, %v2683_v28  ;;  %v962_v42 = vsel %vm3630_vm12, %v2698_v30, %v2699_v29 }
 0x158   : > { %v2692_v36 = vpop.permute.xlu0 %2691  ;;  %v955_v37 = vpop.permute.xlu1 %954  ;;  %v2539_v38 = vpack.c.bf16 %v938_v31, %v926_v33  ;;  %v2541_v39 = vpack.c.bf16 %v937_v35, %v925_v34  ;;  %v1126_v61 = vsub.s32 0, %v1125_v58  ;;  %v3220_v2 = vrot.slane %v299_v60, %v1130_v62 }
 0x159   : > { %v2694_v40 = vunpack.i.h.bf16 %v2692_v36  ;;  %v2693_v41 = vunpack.i.l.bf16 %v2692_v36  ;;  %2555 = vmatpush3.bf16.msra.mxu1 %v2554_v32  ;;  %v961_v45 = vsel %vm3630_vm12, %v955_v37, %v2698_v30 }
 0x15a   : > { %2540 = vmatprep.subr.bf16.mxu0 %v2539_v38  ;;  %2556 = vmatprep.subr.bf16.mxu1 %v2835_v55  ;;  %v3218_v1 = vrot.slane %v299_v60, %v1126_v61 }
 0x15b   : > { %v2557_v43 = vpack.c.bf16 %v2699_v29, %v2694_v40  ;;  %v949_v44 = vsel %vm3629_vm13, %v3179_v63, %v2693_v41  ;;  %2542 = vmatpush1.bf16.msra.mxu0 %v2541_v39  ;;  %v950_v46 = vsel %vm3629_vm13, %v2693_v41, %v2694_v40  ;;  %v3216_v63 = vrot.slane %v299_v60, %v1134_v59 }
 0x15c   : > { %v2545_v47 = vpack.c.bf16 %v961_v45, %v949_v44  ;;  %v969_v48 = vpop.permute.xlu0 %968  ;;  %v971_v49 = vpop.permute.xlu1 %970  ;;  %v2543_v50 = vpack.c.bf16 %v962_v42, %v950_v46 }
 0x15d   : > { %2558 = vmatpush3.bf16.msra.mxu1 %v2557_v43  ;;  %v974_v52 = vsel %vm3628_vm14, %v969_v48, %v971_v49 }
 0x15e   : > { %2544 = vmatprep.subr.bf16.mxu0 %v2543_v50  ;;  %2471 = vmatprep.subr.mxu1 %v3199_v51 }
 0x15f   : > { %2546 = vmatpush1.bf16.msra.mxu0 %v2545_v47 }
 0x160   : > { %v967_v54 = vpop.permute.xlu0 %966  ;;  %998 = vmatprep.subr.mxu0 %v974_v52 }
 0x161   : > { %2472 = vmatpush3.msra.mxu1 %v971_v49  ;;  %v973_v56 = vsel %vm3628_vm14, %v967_v54, %v969_v48 }
 0x162   : > { %2474 = vmatmul.mubr.msk.f32.vlgmr.msra.gmra.mrb[0].mxu1 %vm3619_vm15, %v878_v53  ;;  %2567 = vmatprep.subr.bf16.mxu1 %v2835_v55 }
 0x163   : > { %999 = vmatpush1.msra.mxu0 %v973_v56  ;;  %2486 = vmatprep.mubr.msk.f32.mxu1 %vm3627_vm3, %v3199_v51 }
 0x164   : > { %2401 = vmatmul.mubr.msk.f32.vlgmr.msra.gmra.mrb[0].mxu0 %vm3619_vm15, %v878_v53 }
 0x165   : > { %1347 = vmatprep.mubr.f32.mxu0 %v3199_v51 }
 0x235   : > { %v1119_v0 = vpop.f32.mrb[0].mxu1 }
 0x236   : > { %v1141_v3 = vmul.f32 %v3216_v63, %v1119_v0  ;;  %v2475_v4 = vpop.f32.mrb[1].mxu1 }
 0x237   : > { %v1048_v5 = vpop.f32.mrb[0].mxu0 }
 0x238   : > { %v1050_v6 = vpop.f32.mrb[1].mxu0  ;;  %v1147_v7 = vmul.f32 0.2, %v1141_v3  ;;  %vm1144_vm15 = vcmp.ge.f32.partialorder %v1141_v3, 0.0  ;;  %v1139_v8 = vmul.f32 %v3218_v1, %v1048_v5 }
 0x239   : > { %v1140_v9 = vmul.f32 %v3220_v2, %v1050_v6 }
 0x23a   : > { %v1150_v10 = vsel %vm1144_vm15, %v1141_v3, %v1147_v7  ;;  %v1145_v12 = vmul.f32 0.2, %v1139_v8  ;;  %vm1142_vm2 = vcmp.ge.f32.partialorder %v1139_v8, 0.0 }
 0x23b   : > { %v1146_v11 = vmul.f32 0.2, %v1140_v9  ;;  %1158 = vrot.lane.b32.xlu0 %v1150_v10, %s2819_s8  ;;  %vm1143_vm6 = vcmp.ge.f32.partialorder %v1140_v9, 0.0 }
 0x23c   : > { %v1148_v14 = vsel %vm1142_vm2, %v1139_v8, %v1145_v12  ;;  %vm3624_vm2 = vcmask 1043456  }
 0x23d   : > { %v1149_v13 = vsel %vm1143_vm6, %v1140_v9, %v1146_v11  ;;  %vm1273_vm6 = vcmask 293888  }
 0x23e   : > { %1156 = vrot.lane.b32.xlu1 %v1149_v13, %s2819_s8 }
 0x242   : > { %1154 = vrot.lane.b32.xlu1 %v1148_v14, %s2819_s8 }
 0x2ad   : > { %v1159_v15 = vpop.permute.xlu0 %1158 }
 0x2b0   : > { %v1157_v16 = vpop.permute.xlu1 %1156 }
 0x2b1   : > { %v1162_v17 = vsel %vm1160_vm5, %v1157_v16, %v1159_v15 }
 0x2b2   : > { %v1168_v19 = vsel %vm1167_vm1, %v1162_v17, 0.0 }
 0x2b3   : > { %v1174_v25 = vrot.slane %v1168_v19, 4 }
 0x2b4   : > { %v1155_v18 = vpop.permute.xlu1 %1154 }
 0x2b5   : > { %v1161_v20 = vsel %vm1160_vm5, %v1155_v18, %v1157_v16  ;;  %v1166_v21 = vsel %vm1160_vm5, 0.0, %v1155_v18 }
 0x2b6   : > { %1186 = vrot.lane.b32.xlu0 %v1166_v21, %s2834_s23  ;;  %v2700_v22 = vpack.i.bf16 %v1168_v19, %v1161_v20  ;;  %v1172_v23 = vrot.slane %v1166_v21, 4  ;;  %v1173_v24 = vrot.slane %v1161_v20, 4 }
 0x2b8   : > { %2701 = vrot.lane.b32.xlu1 %v2700_v22, %s2834_s23  ;;  %v2715_v26 = vpack.i.bf16 %v1174_v25, %v1173_v24 }
 0x2ba   : > { %1208 = vrot.lane.b32.xlu0 %v1166_v21, %s2832_s21 }
 0x2bc   : > { %1175 = vrot.lane.b32.xlu1 %v1172_v23, %s2818_s30 }
 0x2be   : > { %2706 = vrot.lane.b32.xlu0 %v2700_v22, %s2832_s21 }
 0x2c0   : > { %1197 = vrot.lane.b32.xlu1 %v1172_v23, %s2836_s26 }
 0x2c2   : > { %2711 = vrot.lane.b32.xlu0 %v2700_v22, %s2837_s27 }
 0x2c4   : > { %1219 = vrot.lane.b32.xlu1 %v1172_v23, %s2838_s28 }
 0x2c6   : > { %2716 = vrot.lane.b32.xlu0 %v2715_v26, %s2818_s30 }
 0x2c8   : > { %2726 = vrot.lane.b32.xlu1 %v2715_v26, %s2838_s28 }
 0x2ca   : > { %2721 = vrot.lane.b32.xlu0 %v2715_v26, %s2836_s26 }
 0x2cc   : > { %2731 = vrot.lane.b32.xlu1 %v2715_v26, %s2829_s18 }
 0x2ce   : > { %1230 = vrot.lane.b32.xlu0 %v1166_v21, %s2837_s27 }
 0x2d0   : > { %1241 = vrot.lane.b32.xlu1 %v1172_v23, %s2829_s18 }
 0x2d2   : > { %1254 = vrot.lane.b32.xlu0 %v1161_v20, %s2840_s29 }
 0x2d4   : > { %1256 = vrot.lane.b32.xlu1 %v1168_v19, %s2840_s29 }
 0x2d6   : > { %1252 = vrot.lane.b32.xlu0 %v1166_v21, %s2840_s29 }
 0x328   : > { %v1187_v27 = vpop.permute.xlu0 %1186 }
 0x32a   : > { %v2702_v28 = vpop.permute.xlu1 %2701 }
 0x32b   : > { %v2704_v35 = vunpack.i.h.bf16 %v2702_v28  ;;  %v2703_v36 = vunpack.i.l.bf16 %v2702_v28 }
 0x32c   : > { %v1209_v29 = vpop.permute.xlu0 %1208 }
 0x32d   : > { %v1192_v47 = vsel %vm900_vm9, %v1187_v27, %v2703_v36  ;;  %v1193_v48 = vsel %vm900_vm9, %v2703_v36, %v2704_v35 }
 0x32e   : > { %v1176_v30 = vpop.permute.xlu1 %1175 }
 0x330   : > { %v2707_v31 = vpop.permute.xlu0 %2706 }
 0x331   : > { %v2709_v38 = vunpack.i.h.bf16 %v2707_v31  ;;  %v2708_v39 = vunpack.i.l.bf16 %v2707_v31 }
 0x332   : > { %v1198_v32 = vpop.permute.xlu1 %1197 }
 0x333   : > { %v1214_v53 = vsel %vm3631_vm11, %v1209_v29, %v2708_v39  ;;  %v1215_v54 = vsel %vm3631_vm11, %v2708_v39, %v2709_v38 }
 0x334   : > { %v2712_v33 = vpop.permute.xlu0 %2711 }
 0x335   : > { %v2714_v42 = vunpack.i.h.bf16 %v2712_v33  ;;  %v2713_v43 = vunpack.i.l.bf16 %v2712_v33 }
 0x336   : > { %v1220_v34 = vpop.permute.xlu1 %1219 }
 0x337   : > { %v1237_v58 = vsel %vm3629_vm13, %v2713_v43, %v2714_v42 }
 0x338   : > { %v2717_v37 = vpop.permute.xlu0 %2716 }
 0x339   : > { %v2719_v40 = vunpack.i.h.bf16 %v2717_v37  ;;  %v2718_v41 = vunpack.i.l.bf16 %v2717_v37 }
 0x33a   : > { %v2727_v44 = vpop.permute.xlu1 %2726 }
 0x33b   : > { %v1181_v45 = vsel %vm888_vm7, %v1176_v30, %v2718_v41  ;;  %v1182_v46 = vsel %vm888_vm7, %v2718_v41, %v2719_v40  ;;  %v2729_v49 = vunpack.i.h.bf16 %v2727_v44  ;;  %v2728_v50 = vunpack.i.l.bf16 %v2727_v44 }
 0x33c   : > { %v2722_v52 = vpop.permute.xlu0 %2721  ;;  %v1263_v59 = vsel %vm3624_vm2, %v1168_v19, %v2719_v40  ;;  %v1262_v61 = vsel %vm3624_vm2, %v1161_v20, %v1182_v46  ;;  %v1261_v62 = vsel %vm3624_vm2, %v1166_v21, %v1181_v45 }
 0x33d   : > { %v2724_v56 = vunpack.i.h.bf16 %v2722_v52  ;;  %v2723_v57 = vunpack.i.l.bf16 %v2722_v52  ;;  %v1226_v6 = vsel %vm3632_vm10, %v2728_v50, %v2729_v49  ;;  %v1225_v11 = vsel %vm3632_vm10, %v1220_v34, %v2728_v50 }
 0x33e   : > { %v2732_v60 = vpop.permute.xlu1 %2731  ;;  %v1269_v15 = vsel %vm3624_vm2, %v2709_v38, %v2729_v49  ;;  %v1268_v21 = vsel %vm3624_vm2, %v1215_v54, %v1226_v6  ;;  %v1267_v24 = vsel %vm3624_vm2, %v1214_v53, %v1225_v11  ;;  %v1718_v6 = vld [vmem:[%s3325_s16 + $0x31] sm:$0x1]  ;;  %v1738_v11 = vld [vmem:[%s3325_s16 + $0x12] sm:$0x1] }
 0x33f   : > { %v1266_v0 = vsel %vm3624_vm2, %v2704_v35, %v2724_v56  ;;  %v1203_v3 = vsel %vm912_vm8, %v1198_v32, %v2723_v57  ;;  %v1204_v4 = vsel %vm912_vm8, %v2723_v57, %v2724_v56  ;;  %v2734_v5 = vunpack.i.h.bf16 %v2732_v60  ;;  %v1169_v32 = vld [vmem:[%s3612_s3] sm:$0xff]  ;;  %v1694_v57 = vld [vmem:[%s3325_s16 + $0x10] sm:$0x1] }
 0x340   : > { %v2568_v7 = vpack.c.bf16 %v1266_v0, %v1263_v59  ;;  %v2733_v8 = vunpack.i.l.bf16 %v2732_v60  ;;  %v1231_v9 = vpop.permute.xlu0 %1230  ;;  %v1265_v10 = vsel %vm3624_vm2, %v1193_v48, %v1204_v4  ;;  %v1264_v14 = vsel %vm3624_vm2, %v1192_v47, %v1203_v3  ;;  %v1693_v56 = vld [vmem:[%s3325_s16] sm:$0x1]  ;;  %v1696_v59 = vld [vmem:[%s3325_s16 + $0x30] sm:$0x1]  ;;  %v1716_v0 = vld [vmem:[%s3325_s16 + $0x11] sm:$0x1] }
 0x341   : > { %v1272_v12 = vsel %vm3624_vm2, %v2714_v42, %v2734_v5  ;;  %v2559_v13 = vpack.c.bf16 %v1265_v10, %v1262_v61  ;;  %v1236_v17 = vsel %vm3629_vm13, %v1231_v9, %v2713_v43  ;;  %v2561_v19 = vpack.c.bf16 %v1264_v14, %v1261_v62  ;;  %v1715_v62 = vld [vmem:[%s3325_s16 + $0x1] sm:$0x1]  ;;  %v1737_v10 = vld [vmem:[%s3325_s16 + $0x2] sm:$0x1] }
 0x342   : > { %v1248_v16 = vsel %vm3630_vm12, %v2733_v8, %v2734_v5  ;;  %v1242_v18 = vpop.permute.xlu1 %1241  ;;  %2569 = vmatpush3.bf16.msra.mxu1 %v2568_v7  ;;  %v2571_v23 = vpack.c.bf16 %v1272_v12, %v1269_v15  ;;  %v1701_v60 = vrot.slane %v1694_v57, 7  ;;  %v1707_v4 = vrot.slane %v1696_v59, 5  ;;  %v1717_v5 = vld [vmem:[%s3325_s16 + $0x21] sm:$0x1]  ;;  %v1739_v15 = vld [vmem:[%s3325_s16 + $0x22] sm:$0x1] }
 0x343   : > { %v1247_v20 = vsel %vm3630_vm12, %v1242_v18, %v2733_v8  ;;  %2560 = vmatprep.subr.bf16.mxu0 %v2559_v13  ;;  %v1271_v22 = vsel %vm3624_vm2, %v1237_v58, %v1248_v16  ;;  %2570 = vmatprep.subr.bf16.mxu1 %v2835_v55  ;;  %v1695_v58 = vld [vmem:[%s3325_s16 + $0x20] sm:$0x1]  ;;  %v1723_v7 = vrot.slane %v1716_v0, 7  ;;  %v1726_v9 = vrot.slane %v1717_v5, 6  ;;  %v1740_v16 = vld [vmem:[%s3325_s16 + $0x32] sm:$0x1] }
 0x344   : > { %v1270_v25 = vsel %vm3624_vm2, %v1236_v17, %v1247_v20  ;;  %v1255_v26 = vpop.permute.xlu0 %1254  ;;  %2562 = vmatpush1.bf16.msra.mxu0 %v2561_v19  ;;  %v2563_v27 = vpack.c.bf16 %v1271_v22, %v1268_v21  ;;  %v1704_v61 = vrot.slane %v1695_v58, 6  ;;  %v1702_v3 = vsel %vm321_vm0, %v1701_v60, %v1693_v56  ;;  %v1759_v22 = vld [vmem:[%s3325_s16 + $0x3] sm:$0x1]  ;;  %v1783_v56 = vld [vmem:[%s3325_s16 + $0x24] sm:$0x1] }
 0x345   : > { %v2565_v28 = vpack.c.bf16 %v1270_v25, %v1267_v24  ;;  %v1703_v8 = vsel %vm333_vm4, %v1701_v60, %v1702_v3  ;;  %v1724_v13 = vsel %vm321_vm0, %v1723_v7, %v1715_v62  ;;  %v1729_v14 = vrot.slane %v1718_v6, 5  ;;  %v1784_v57 = vld [vmem:[%s3325_s16 + $0x34] sm:$0x1]  ;;  %v1803_v62 = vld [vmem:[%s3325_s16 + $0x5] sm:$0x1] }
 0x346   : > { %2564 = vmatprep.subr.bf16.mxu0 %v2563_v27  ;;  %v1257_v29 = vpop.permute.xlu1 %1256  ;;  %2572 = vmatpush3.bf16.msra.mxu1 %v2571_v23  ;;  %v1745_v17 = vrot.slane %v1738_v11, 7  ;;  %v1725_v19 = vsel %vm333_vm4, %v1723_v7, %v1724_v13  ;;  %v1748_v20 = vrot.slane %v1739_v15, 6  ;;  %v1751_v21 = vrot.slane %v1740_v16, 5  ;;  %v1760_v23 = vld [vmem:[%s3325_s16 + $0x13] sm:$0x1] }
 0x347   : > { %v1259_v30 = vsel %vm3628_vm14, %v1255_v26, %v1257_v29  ;;  %2484 = vmatprep.subr.mxu1 %v3199_v51  ;;  %v1761_v27 = vld [vmem:[%s3325_s16 + $0x23] sm:$0x1]  ;;  %v1804_v0 = vld [vmem:[%s3325_s16 + $0x15] sm:$0x1]  ;;  %v1792_v5 = vrot.slane %v1783_v56, 6  ;;  %v1795_v6 = vrot.slane %v1784_v57, 5 }
 0x348   : > { %v1253_v31 = vpop.permute.xlu0 %1252  ;;  %2566 = vmatpush1.bf16.msra.mxu0 %v2565_v28  ;;  %v1762_v28 = vld [vmem:[%s3325_s16 + $0x33] sm:$0x1]  ;;  %v1805_v7 = vld [vmem:[%s3325_s16 + $0x25] sm:$0x1]  ;;  %v1851_v13 = vld [vmem:[%s3325_s16 + $0x7] sm:$0x1] }
 0x349   : > { %2403 = vmatprep.subr.msk.mxu0 %vm3624_vm2, %v1259_v30  ;;  %v1258_v33 = vsel %vm3628_vm14, %v1253_v31, %v1255_v26  ;;  %v1746_v26 = vsel %vm321_vm0, %v1745_v17, %v1737_v10 }
 0x34a   : > { %2485 = vmatpush3.msk.msra.mxu1 %vm3624_vm2, %v1257_v29  ;;  %v1767_v29 = vrot.slane %v1760_v23, 7 }
 0x34b   : > { %2487 = vmatmul.mubr.msk.f32.vlgmr.msra.gmra.mrb[2].mxu1 %vm1273_vm6, %v1169_v32  ;;  %2590 = vmatprep.subr.bf16.mxu1 %v2835_v55 }
 0x34c   : > { %2404 = vmatpush1.msk.msra.mxu0 %vm3624_vm2, %v1258_v33  ;;  %2507 = vmatprep.mubr.msk.f32.mxu1 %vm3627_vm3, %v3199_v51  ;;  %vm3637_vm3 = vcmask 1046534   ;;  %v1770_v33 = vrot.slane %v1761_v27, 6 }
 0x34d   : > { %2405 = vmatmul.mubr.msk.f32.vlgmr.msra.gmra.mrb[2].mxu0 %vm1273_vm6, %v1169_v32  ;;  %v1747_v32 = vsel %vm333_vm4, %v1745_v17, %v1746_v26  ;;  %v1814_v17 = vrot.slane %v1805_v7, 6 }
 0x34e   : > { %1610 = vmatprep.mubr.f32.mxu0 %v3199_v51 }
 0x41e   : > { %v1420_v34 = vpop.f32.mrb[2].mxu1 }
 0x41f   : > { %v1426_v35 = vmul.f32 %v1420_v34, %v3216_v63  ;;  %v2488_v36 = vpop.f32.mrb[3].mxu1  ;;  %v1825_v34 = vld [vmem:[%s3325_s16 + $0x6] sm:$0x1] }
 0x420   : > { %v1349_v37 = vpop.f32.mrb[2].mxu0 }
 0x421   : > { %v1351_v38 = vpop.f32.mrb[3].mxu0  ;;  %v1432_v39 = vmul.f32 0.2, %v1426_v35  ;;  %vm1429_vm15 = vcmp.ge.f32.partialorder %v1426_v35, 0.0  ;;  %v1424_v40 = vmul.f32 %v1349_v37, %v3218_v1 }
 0x422   : > { %v1425_v41 = vmul.f32 %v1351_v38, %v3220_v2  ;;  %v1768_v38 = vsel %vm321_vm0, %v1767_v29, %v1759_v22 }
 0x423   : > { %v1435_v42 = vsel %vm1429_vm15, %v1426_v35, %v1432_v39  ;;  %v1430_v44 = vmul.f32 0.2, %v1424_v40  ;;  %vm1427_vm6 = vcmp.ge.f32.partialorder %v1424_v40, 0.0  ;;  %vm3634_vm15 = vcmask 1046534   ;;  %v1826_v35 = vld [vmem:[%s3325_s16 + $0x16] sm:$0x1] }
 0x424   : > { %v1431_v43 = vmul.f32 0.2, %v1425_v41  ;;  %1443 = vrot.lane.b32.xlu0 %v1435_v42, %s2819_s8  ;;  %vm1428_vm2 = vcmp.ge.f32.partialorder %v1425_v41, 0.0  ;;  %v1773_v39 = vrot.slane %v1762_v28, 5 }
 0x425   : > { %v1433_v51 = vsel %vm1427_vm6, %v1424_v40, %v1430_v44  ;;  %vm3635_vm6 = vcmask 1043459   ;;  %v1827_v40 = vld [vmem:[%s3325_s16 + $0x26] sm:$0x1]  ;;  %v1769_v44 = vsel %vm333_vm4, %v1767_v29, %v1768_v38 }
 0x426   : > { %v1434_v45 = vsel %vm1428_vm2, %v1425_v41, %v1431_v43  ;;  %vm3633_vm2 = vcmask 1042434   ;;  %v1828_v41 = vld [vmem:[%s3325_s16 + $0x36] sm:$0x1] }
 0x427   : > { %1441 = vrot.lane.b32.xlu1 %v1434_v45, %s2819_s8  ;;  %v1705_v12 = vsel %vm3633_vm2, %v1704_v61, %v1703_v8  ;;  %v1727_v25 = vsel %vm3633_vm2, %v1726_v9, %v1725_v19  ;;  %v1749_v37 = vsel %vm3633_vm2, %v1748_v20, %v1747_v32  ;;  %v1833_v45 = vrot.slane %v1826_v35, 7  ;;  %v1806_v8 = vld [vmem:[%s3325_s16 + $0x35] sm:$0x1]  ;;  %v1853_v19 = vld [vmem:[%s3325_s16 + $0x27] sm:$0x1] }
 0x428   : > { %v1706_v18 = vsel %vm3634_vm15, %v1704_v61, %v1705_v12  ;;  %vm3636_vm15 = vcmask 1047559   ;;  %v1728_v31 = vsel %vm3637_vm3, %v1726_v9, %v1727_v25  ;;  %v1811_v12 = vrot.slane %v1804_v0, 7  ;;  %v1874_v25 = vld [vmem:[%s3325_s16 + $0x18] sm:$0x1] }
 0x429   : > { %v1708_v24 = vsel %vm3635_vm6, %v1707_v4, %v1706_v18  ;;  %v1730_v36 = vsel %vm3635_vm6, %v1729_v14, %v1728_v31  ;;  %vm3638_vm3 = vmmov %vm3636_vm15  ;;  %v1834_v60 = vsel %vm321_vm0, %v1833_v45, %v1825_v34  ;;  %v1817_v18 = vrot.slane %v1806_v8, 5  ;;  %v1876_v31 = vld [vmem:[%s3325_s16 + $0x38] sm:$0x1] }
 0x42a   : > { %v1709_v30 = vsel %vm3636_vm15, %v1707_v4, %v1708_v24  ;;  %v1731_v42 = vsel %vm3638_vm3, %v1729_v14, %v1730_v36  ;;  %vm3639_vm15 = vcmask 1046534   ;;  %v1835_v4 = vsel %vm333_vm4, %v1833_v45, %v1834_v60  ;;  %v1852_v14 = vld [vmem:[%s3325_s16 + $0x17] sm:$0x1]  ;;  %v1873_v36 = vld [vmem:[%s3325_s16 + $0x8] sm:$0x1] }
 0x42b   : > { %1439 = vrot.lane.b32.xlu1 %v1433_v51, %s2819_s8  ;;  %v1750_v43 = vsel %vm3639_vm15, %v1748_v20, %v1749_v37  ;;  %v1781_v51 = vld [vmem:[%s3325_s16 + $0x4] sm:$0x1]  ;;  %v1854_v20 = vld [vmem:[%s3325_s16 + $0x37] sm:$0x1]  ;;  %v1812_v23 = vsel %vm321_vm0, %v1811_v12, %v1803_v62  ;;  %v1859_v24 = vrot.slane %v1852_v14, 7  ;;  %v1862_v29 = vrot.slane %v1853_v19, 6 }
 0x42c   : > { %v1813_v28 = vsel %vm333_vm4, %v1811_v12, %v1812_v23  ;;  %v1865_v35 = vrot.slane %v1854_v20, 5  ;;  %v1896_v37 = vld [vmem:[%s3325_s16 + $0x19] sm:$0x1]  ;;  %v1983_v14 = vld [vmem:[%s3325_s16 + $0xd] sm:$0x1] }
 0x42d   : > { %v1860_v34 = vsel %vm321_vm0, %v1859_v24, %v1851_v13  ;;  %v1903_v57 = vrot.slane %v1896_v37, 7  ;;  %v1940_v20 = vld [vmem:[%s3325_s16 + $0x1b] sm:$0x1]  ;;  %v1963_v37 = vld [vmem:[%s3325_s16 + $0x2c] sm:$0x1] }
 0x496   : > { %v1444_v49 = vpop.permute.xlu0 %1443 }
 0x499   : > { %v1442_v46 = vpop.permute.xlu1 %1441 }
 0x49a   : > { %v3304_v50 = vsel %vm1160_vm5, %v1442_v46, %v1444_v49  ;;  %v1771_v49 = vsel %vm3633_vm2, %v1770_v33, %v1769_v44  ;;  %vm3640_vm2 = vmmov %vm3638_vm3 }
 0x49b   : > { %v1451_v53 = vsel %vm1167_vm1, %v3304_v50, 0.0  ;;  %v1772_v59 = vsel %vm3639_vm15, %v1770_v33, %v1771_v49  ;;  %v1918_v49 = vld [vmem:[%s3325_s16 + $0x1a] sm:$0x1] }
 0x49c   : > { %v1774_v3 = vsel %vm3635_vm6, %v1773_v39, %v1772_v59  ;;  %v1920_v59 = vld [vmem:[%s3325_s16 + $0x3a] sm:$0x1]  ;;  %v1925_v8 = vrot.slane %v1918_v49, 7  ;;  %v2012_v49 = vld [vmem:[%s3325_s16 + $0x2e] sm:$0x1] }
 0x49d   : > { %v3295_v47 = vpop.permute.xlu1 %1439  ;;  %v1775_v9 = vsel %vm3640_vm2, %v1773_v39, %v1774_v3  ;;  %v1917_v3 = vld [vmem:[%s3325_s16 + $0xa] sm:$0x1]  ;;  %v1931_v13 = vrot.slane %v1920_v59, 5  ;;  %v2010_v59 = vld [vmem:[%s3325_s16 + $0xe] sm:$0x1] }
 0x49e   : > { %v1450_v48 = vsel %vm1160_vm5, 0.0, %v3295_v47  ;;  %v3308_v52 = vsel %vm1160_vm5, %v3295_v47, %v1442_v46  ;;  %v1782_v46 = vld [vmem:[%s3325_s16 + $0x14] sm:$0x1] }
 0x49f   : > { %1466 = vrot.lane.b32.xlu0 %v1450_v48, %s2834_s23  ;;  %1455 = vrot.lane.b32.xlu1 %v1450_v48, %s2818_s30  ;;  %v2745_v54 = vpack.i.bf16 %v1451_v53, %v3308_v52  ;;  %v1789_v61 = vrot.slane %v1782_v46, 7  ;;  %v1887_v46 = vrot.slane %v1876_v31, 5  ;;  %v1939_v31 = vld [vmem:[%s3325_s16 + $0xb] sm:$0x1] }
 0x4a1   : > { %v1790_v11 = vsel %vm321_vm0, %v1789_v61, %v1781_v51 }
 0x4a2   : > { %v1791_v16 = vsel %vm333_vm4, %v1789_v61, %v1790_v11 }
 0x4a3   : > { %1488 = vrot.lane.b32.xlu0 %v1450_v48, %s2832_s21  ;;  %1477 = vrot.lane.b32.xlu1 %v1450_v48, %s2836_s26 }
 0x4a7   : > { %1510 = vrot.lane.b32.xlu0 %v1450_v48, %s2837_s27  ;;  %1499 = vrot.lane.b32.xlu1 %v1450_v48, %s2838_s28 }
 0x4ab   : > { %2746 = vrot.lane.b32.xlu1 %v2745_v54, %s2836_s26  ;;  %2736 = vrot.lane.b32.xlu0 %v2745_v54, %s2818_s30 }
 0x4af   : > { %2756 = vrot.lane.b32.xlu1 %v2745_v54, %s2838_s28  ;;  %2741 = vrot.lane.b32.xlu0 %v2745_v54, %s2834_s23 }
 0x4b3   : > { %2766 = vrot.lane.b32.xlu1 %v2745_v54, %s2829_s18  ;;  %2751 = vrot.lane.b32.xlu0 %v2745_v54, %s2832_s21 }
 0x4b7   : > { %1521 = vrot.lane.b32.xlu1 %v1450_v48, %s2829_s18  ;;  %2761 = vrot.lane.b32.xlu0 %v2745_v54, %s2837_s27  ;;  %v1839_v54 = vrot.slane %v1828_v41, 5  ;;  %v1881_v41 = vrot.slane %v1874_v25, 7  ;;  %v1941_v25 = vld [vmem:[%s3325_s16 + $0x2b] sm:$0x1] }
 0x4b9   : > { %v1882_v56 = vsel %vm321_vm0, %v1881_v41, %v1873_v36  ;;  %v1947_v36 = vrot.slane %v1940_v20, 7 }
 0x4ba   : > { %v1883_v61 = vsel %vm333_vm4, %v1881_v41, %v1882_v56  ;;  %v1950_v41 = vrot.slane %v1941_v25, 6 }
 0x4bb   : > { %1536 = vrot.lane.b32.xlu1 %v1451_v53, %s2840_s29  ;;  %1534 = vrot.lane.b32.xlu0 %v3308_v52, %s2840_s29  ;;  %v1836_v53 = vrot.slane %v1827_v40, 6  ;;  %v1861_v40 = vsel %vm333_vm4, %v1859_v24, %v1860_v34 }
 0x4bf   : > { %1532 = vrot.lane.b32.xlu0 %v1450_v48, %s2840_s29  ;;  %1710 = vrot.lane.b32.xlu1 %v1709_v30, %s2819_s8  ;;  %v1752_v48 = vsel %vm3635_vm6, %v1751_v21, %v1750_v43  ;;  %v1875_v30 = vld [vmem:[%s3325_s16 + $0x28] sm:$0x1]  ;;  %v1898_v43 = vld [vmem:[%s3325_s16 + $0x39] sm:$0x1] }
 0x4c0   : > { %v1753_v58 = vsel %vm3638_vm3, %v1751_v21, %v1752_v48  ;;  %vm3641_vm3 = vcmask 1042434   ;;  %v1884_v51 = vrot.slane %v1875_v30, 6  ;;  %v1895_v48 = vld [vmem:[%s3325_s16 + $0x9] sm:$0x1]  ;;  %v1909_v0 = vrot.slane %v1898_v43, 5 }
 0x4c1   : > { %v1837_v10 = vsel %vm3641_vm3, %v1836_v53, %v1835_v4  ;;  %vm3642_vm2 = vmmov %vm3641_vm3  ;;  %vm3643_vm3 = vcmask 1047559   ;;  %v1984_v4 = vld [vmem:[%s3325_s16 + $0x1d] sm:$0x1]  ;;  %v1904_v7 = vsel %vm321_vm0, %v1903_v57, %v1895_v48  ;;  %v1961_v43 = vld [vmem:[%s3325_s16 + $0xc] sm:$0x1] }
 0x4c2   : > { %v1838_v15 = vsel %vm3639_vm15, %v1836_v53, %v1837_v10  ;;  %v1793_v22 = vsel %vm3642_vm2, %v1792_v5, %v1791_v16  ;;  %v1815_v33 = vsel %vm3642_vm2, %v1814_v17, %v1813_v28  ;;  %v1863_v45 = vsel %vm3642_vm2, %v1862_v29, %v1861_v40  ;;  %vm3644_vm2 = vmmov %vm3643_vm3 }
 0x4c3   : > { %1732 = vrot.lane.b32.xlu0 %v1731_v42, %s2822_s11  ;;  %1754 = vrot.lane.b32.xlu1 %v1753_v58, %s2824_s13  ;;  %v1840_v21 = vsel %vm3635_vm6, %v1839_v54, %v1838_v15  ;;  %v1794_v27 = vsel %vm3639_vm15, %v1792_v5, %v1793_v22  ;;  %v1816_v39 = vsel %vm3639_vm15, %v1814_v17, %v1815_v33  ;;  %v1897_v42 = vld [vmem:[%s3325_s16 + $0x29] sm:$0x1]  ;;  %v1919_v58 = vld [vmem:[%s3325_s16 + $0x2a] sm:$0x1]  ;;  %v1991_v19 = vrot.slane %v1984_v4, 7  ;;  %s3662_s11 = smov 15  }
 0x4c4   : > { %v1841_v26 = vsel %vm3643_vm3, %v1839_v54, %v1840_v21  ;;  %v1796_v32 = vsel %vm3635_vm6, %v1795_v6, %v1794_v27  ;;  %v1818_v44 = vsel %vm3635_vm6, %v1817_v18, %v1816_v39  ;;  %v1864_v54 = vsel %vm3639_vm15, %v1862_v29, %v1863_v45  ;;  %v1986_v15 = vld [vmem:[%s3325_s16 + $0x3d] sm:$0x1]  ;;  %v2034_v4 = vld [vmem:[%s3325_s16 + $0x2f] sm:$0x1] }
 0x4c5   : > { %v1797_v38 = vsel %vm3643_vm3, %v1795_v6, %v1796_v32  ;;  %v1819_v53 = vsel %vm3643_vm3, %v1817_v18, %v1818_v44  ;;  %v1866_v60 = vsel %vm3635_vm6, %v1865_v35, %v1864_v54  ;;  %v1906_v62 = vrot.slane %v1897_v42, 6  ;;  %v1962_v32 = vld [vmem:[%s3325_s16 + $0x1c] sm:$0x1]  ;;  %v2011_v44 = vld [vmem:[%s3325_s16 + $0x1e] sm:$0x1] }
 0x4c6   : > { %v1867_v5 = vsel %vm3644_vm2, %v1865_v35, %v1866_v60  ;;  %vm3645_vm3 = vcmask 1042434   ;;  %v1905_v11 = vsel %vm333_vm4, %v1903_v57, %v1904_v7  ;;  %v1928_v12 = vrot.slane %v1919_v58, 6  ;;  %v2033_v60 = vld [vmem:[%s3325_s16 + $0x1f] sm:$0x1] }
 0x4c7   : > { %1776 = vrot.lane.b32.xlu0 %v1775_v9, %s2826_s15  ;;  %1842 = vrot.lane.b32.xlu1 %v1841_v26, %s2818_s30  ;;  %v1885_v6 = vsel %vm3645_vm3, %v1884_v51, %v1883_v61  ;;  %v1985_v9 = vld [vmem:[%s3325_s16 + $0x2d] sm:$0x1]  ;;  %vm3646_vm2 = vmmov %vm3645_vm3  ;;  %v1926_v18 = vsel %vm321_vm0, %v1925_v8, %v1917_v3  ;;  %vm3647_vm3 = vcmask 1047559   ;;  %v1942_v26 = vld [vmem:[%s3325_s16 + $0x3b] sm:$0x1]  ;;  %v1992_v29 = vsel %vm321_vm0, %v1991_v19, %v1983_v14  ;;  %s2631_s15 = smul.u32 12, %s3691_s25 }
 0x4c8   : > { %v1886_v10 = vsel %vm3639_vm15, %v1884_v51, %v1885_v6  ;;  %v1907_v17 = vsel %vm3646_vm2, %v1906_v62, %v1905_v11  ;;  %v1927_v23 = vsel %vm333_vm4, %v1925_v8, %v1926_v18  ;;  %v1994_v24 = vrot.slane %v1985_v9, 6  ;;  %v2032_v9 = vld [vmem:[%s3325_s16 + $0xf] sm:$0x1] }
 0x4c9   : > { %v1888_v16 = vsel %vm3635_vm6, %v1887_v46, %v1886_v10  ;;  %v1908_v22 = vsel %vm3639_vm15, %v1906_v62, %v1907_v17  ;;  %v1929_v28 = vsel %vm3646_vm2, %v1928_v12, %v1927_v23  ;;  %v1997_v30 = vrot.slane %v1986_v15, 5  ;;  %v2035_v10 = vld [vmem:[%s3325_s16 + $0x3f] sm:$0x1] }
 0x4ca   : > { %v1889_v21 = vsel %vm3647_vm3, %v1887_v46, %v1888_v16  ;;  %v1910_v27 = vsel %vm3635_vm6, %v1909_v0, %v1908_v22  ;;  %v1930_v34 = vsel %vm3639_vm15, %v1928_v12, %v1929_v28  ;;  %v1993_v35 = vsel %vm333_vm4, %v1991_v19, %v1992_v29 }
 0x4cb   : > { %1798 = vrot.lane.b32.xlu0 %v1797_v38, %s2829_s18  ;;  %1820 = vrot.lane.b32.xlu1 %v1819_v53, %s2832_s21  ;;  %v1911_v33 = vsel %vm3647_vm3, %v1909_v0, %v1910_v27  ;;  %v1964_v38 = vld [vmem:[%s3325_s16 + $0x3c] sm:$0x1]  ;;  %v1932_v39 = vsel %vm3635_vm6, %v1931_v13, %v1930_v34  ;;  %v1995_v40 = vsel %vm3646_vm2, %v1994_v24, %v1993_v35  ;;  %v1953_v42 = vrot.slane %v1942_v26, 5  ;;  %v2013_v53 = vld [vmem:[%s3325_s16 + $0x3e] sm:$0x1]  ;;  %vm3648_vm2 = vmmov %vm3647_vm3 }
 0x4cc   : > { %v1933_v45 = vsel %vm3647_vm3, %v1931_v13, %v1932_v39  ;;  %v1996_v51 = vsel %vm3639_vm15, %v1994_v24, %v1995_v40  ;;  %v1948_v46 = vsel %vm321_vm0, %v1947_v36, %v1939_v31  ;;  %v1969_v48 = vrot.slane %v1962_v32, 7 }
 0x4cd   : > { %v1998_v54 = vsel %vm3635_vm6, %v1997_v30, %v1996_v51  ;;  %v1949_v56 = vsel %vm333_vm4, %v1947_v36, %v1948_v46  ;;  %v1972_v57 = vrot.slane %v1963_v37, 6  ;;  %v1975_v58 = vrot.slane %v1964_v38, 5 }
 0x4ce   : > { %v1999_v61 = vsel %vm3648_vm2, %v1997_v30, %v1998_v54  ;;  %vm3649_vm3 = vcmask 1042434   ;;  %v1970_v0 = vsel %vm321_vm0, %v1969_v48, %v1961_v43  ;;  %v2018_v3 = vrot.slane %v2011_v44, 7 }
 0x4cf   : > { %1868 = vrot.lane.b32.xlu0 %v1867_v5, %s2820_s9  ;;  %1890 = vrot.lane.b32.xlu1 %v1889_v21, %s2821_s10  ;;  %v1951_v62 = vsel %vm3649_vm3, %v1950_v41, %v1949_v56  ;;  %v1971_v6 = vsel %vm333_vm4, %v1969_v48, %v1970_v0  ;;  %v2021_v7 = vrot.slane %v2012_v49, 6  ;;  %v2024_v8 = vrot.slane %v2013_v53, 5  ;;  %vm3650_vm14 = vmmov %vm3649_vm3  ;;  %s3652_s9 = smov 89   ;;  %s3657_s10 = smov 107  }
 0x4d0   : > { %v1952_v5 = vsel %vm3639_vm15, %v1950_v41, %v1951_v62  ;;  %v1973_v12 = vsel %vm3650_vm14, %v1972_v57, %v1971_v6  ;;  %v2019_v13 = vsel %vm321_vm0, %v2018_v3, %v2010_v59  ;;  %v2040_v14 = vrot.slane %v2033_v60, 7  ;;  %vm3651_vm3 = vmmov %vm3639_vm15 }
 0x4d1   : > { %v1954_v11 = vsel %vm3635_vm6, %v1953_v42, %v1952_v5  ;;  %v1974_v16 = vsel %vm3651_vm3, %v1972_v57, %v1973_v12  ;;  %v2020_v17 = vsel %vm333_vm4, %v2018_v3, %v2019_v13  ;;  %v2043_v18 = vrot.slane %v2034_v4, 6  ;;  %vm3653_vm15 = vmmov %vm3635_vm6 }
 0x4d2   : > { %v1955_v15 = vsel %vm3648_vm2, %v1953_v42, %v1954_v11  ;;  %v1976_v19 = vsel %vm3653_vm15, %v1975_v58, %v1974_v16  ;;  %vm3654_vm13 = vmmov %vm3650_vm14  ;;  %v2041_v21 = vsel %vm321_vm0, %v2040_v14, %v2032_v9  ;;  %v2046_v22 = vrot.slane %v2035_v10, 5 }
 0x4d3   : > { %1912 = vrot.lane.b32.xlu0 %v1911_v33, %s2823_s12  ;;  %1934 = vrot.lane.b32.xlu1 %v1933_v45, %s2825_s14  ;;  %v2022_v20 = vsel %vm3654_vm13, %v2021_v7, %v2020_v17  ;;  %vm3655_vm14 = vmmov %vm3648_vm2  ;;  %v2042_v25 = vsel %vm333_vm4, %v2040_v14, %v2041_v21  ;;  %s3665_s12 = smov 33  }
 0x4d4   : > { %v1977_v23 = vsel %vm3655_vm14, %v1975_v58, %v1976_v19  ;;  %vm3656_vm6 = vmmov %vm3651_vm3 }
 0x4d5   : > { %v2023_v24 = vsel %vm3656_vm6, %v2021_v7, %v2022_v20  ;;  %vm3658_vm2 = vmmov %vm3653_vm15 }
 0x4d6   : > { %v2025_v26 = vsel %vm3658_vm2, %v2024_v8, %v2023_v24  ;;  %vm3659_vm3 = vmmov %vm3654_vm13 }
 0x4d7   : > { %2000 = vrot.lane.b32.xlu0 %v1999_v61, %s2828_s17  ;;  %1956 = vrot.lane.b32.xlu1 %v1955_v15, %s3652_s9  ;;  %v2044_v27 = vsel %vm3659_vm3, %v2043_v18, %v2042_v25  ;;  %vm3660_vm12 = vmmov %vm3655_vm14 }
 0x4d8   : > { %v2026_v28 = vsel %vm3660_vm12, %v2024_v8, %v2025_v26  ;;  %vm3661_vm15 = vmmov %vm3656_vm6 }
 0x4d9   : > { %v2045_v29 = vsel %vm3661_vm15, %v2043_v18, %v2044_v27  ;;  %vm3663_vm0 = vmmov %vm3658_vm2  ;;  %vm3666_vm2 = vcmask 744448   ;;  %vm3668_vm15 = vcmask 752640  }
 0x4da   : > { %v2047_v30 = vsel %vm3663_vm0, %v2046_v22, %v2045_v29  ;;  %vm3664_vm13 = vmmov %vm3660_vm12  ;;  %vm2841_vm12 = vmmov 1  }
 0x4db   : > { %1978 = vrot.lane.b32.xlu0 %v1977_v23, %s3657_s10  ;;  %2027 = vrot.lane.b32.xlu1 %v2026_v28, %s3662_s11  ;;  %v2048_v31 = vsel %vm3664_vm13, %v2046_v22, %v2047_v30  ;;  %vm2408_vm4 = vmneg %vm1160_vm5  ;;  %v3531_v28 = vld [vmem:[#allocation3] sm:$0xff]  ;;  %vm3670_vm13 = vcmask 736256   ;;  %v1452_v30 = vld [vmem:[%s3613_s4] sm:$0xf] }
 0x4dc   : > { %vm2592_vm14 = vmpackc.low %vm2841_vm12, %vm1167_vm1 }
 0x4dd   : > { %vm2576_vm6 = vmpackc.low %vm2841_vm12, %vm2408_vm4  ;;  %vm3672_vm12 = vcmask 588800  }
 0x4de   : > { %vm3667_vm3 = vmmov %vm3666_vm2 }
 0x4df   : > { %2049 = vrot.lane.b32.xlu0 %v2048_v31, %s3665_s12  ;;  %vm3669_vm0 = vmmov %vm3668_vm15 }
 0x4e0   : > { %vm3671_vm4 = vmmov %vm3670_vm13 }
 0x511   : > { %v1467_v32 = vpop.permute.xlu0 %1466  ;;  %v1456_v33 = vpop.permute.xlu1 %1455 }
 0x515   : > { %v1489_v34 = vpop.permute.xlu0 %1488  ;;  %v1478_v35 = vpop.permute.xlu1 %1477 }
 0x519   : > { %v1511_v36 = vpop.permute.xlu0 %1510  ;;  %v1500_v37 = vpop.permute.xlu1 %1499 }
 0x51d   : > { %v2747_v38 = vpop.permute.xlu1 %2746  ;;  %v2737_v39 = vpop.permute.xlu0 %2736 }
 0x51e   : > { %v2739_v40 = vunpack.i.h.bf16 %v2737_v39  ;;  %v2738_v41 = vunpack.i.l.bf16 %v2737_v39  ;;  %v2749_v42 = vunpack.i.h.bf16 %v2747_v38  ;;  %v2748_v43 = vunpack.i.l.bf16 %v2747_v38 }
 0x520   : > { %v2591_v44 = vpack.c.bf16 %v2739_v40, %v3304_v50  ;;  %v1461_v45 = vsel %vm888_vm7, %v1456_v33, %v2738_v41  ;;  %v1462_v51 = vsel %vm888_vm7, %v2738_v41, %v2739_v40  ;;  %v1483_v57 = vsel %vm912_vm8, %v1478_v35, %v2748_v43 }
 0x521   : > { %v2575_v46 = vpack.c.bf16 %v1461_v45, %v3295_v47  ;;  %v2757_v48 = vpop.permute.xlu1 %2756  ;;  %v2742_v49 = vpop.permute.xlu0 %2741  ;;  %v2573_v53 = vpack.c.bf16 %v1462_v51, %v3308_v52  ;;  %v1484_v50 = vsel %vm912_vm8, %v2748_v43, %v2749_v42 }
 0x522   : > { %v2744_v54 = vunpack.i.h.bf16 %v2742_v49  ;;  %v2743_v56 = vunpack.i.l.bf16 %v2742_v49  ;;  %2593 = vmatpush3.bf16.msk.msra.mxu1 %vm2592_vm14, %v2591_v44  ;;  %v2758_v58 = vunpack.i.l.bf16 %v2757_v48  ;;  %v2759_v59 = vunpack.i.h.bf16 %v2757_v48 }
 0x523   : > { %2574 = vmatprep.subr.bf16.mxu0 %v2573_v53  ;;  %2594 = vmatprep.subr.bf16.mxu1 %v2835_v55  ;;  %vm3673_vm14 = vmmov 0  }
 0x524   : > { %v2595_v60 = vpack.c.bf16 %v2749_v42, %v2744_v54  ;;  %v1472_v47 = vsel %vm900_vm9, %v1467_v32, %v2743_v56  ;;  %2577 = vmatpush1.bf16.msk.msra.mxu0 %vm2576_vm6, %v2575_v46  ;;  %v1473_v61 = vsel %vm900_vm9, %v2743_v56, %v2744_v54  ;;  %v1505_v6 = vsel %vm3632_vm10, %v1500_v37, %v2758_v58  ;;  %vm3674_vm6 = vmmov %vm3672_vm12 }
 0x525   : > { %v2580_v52 = vpack.c.bf16 %v1483_v57, %v1472_v47  ;;  %v2767_v62 = vpop.permute.xlu1 %2766  ;;  %v2752_v0 = vpop.permute.xlu0 %2751  ;;  %v2578_v3 = vpack.c.bf16 %v1484_v50, %v1473_v61  ;;  %v1506_v12 = vsel %vm3632_vm10, %v2758_v58, %v2759_v59  ;;  %vm1981_vm10 = vcmask 1003352  }
 0x526   : > { %v2754_v4 = vunpack.i.h.bf16 %v2752_v0  ;;  %v2753_v5 = vunpack.i.l.bf16 %v2752_v0  ;;  %2596 = vmatpush3.bf16.msra.mxu1 %v2595_v60  ;;  %v2769_v7 = vunpack.i.h.bf16 %v2767_v62  ;;  %v2768_v8 = vunpack.i.l.bf16 %v2767_v62 }
 0x527   : > { %2579 = vmatprep.subr.bf16.mxu0 %v2578_v3  ;;  %2597 = vmatprep.subr.bf16.mxu1 %v2835_v55 }
 0x528   : > { %v2598_v9 = vpack.c.bf16 %v2759_v59, %v2754_v4  ;;  %v1494_v10 = vsel %vm3631_vm11, %v1489_v34, %v2753_v5  ;;  %2581 = vmatpush1.bf16.msra.mxu0 %v2580_v52  ;;  %v1495_v11 = vsel %vm3631_vm11, %v2753_v5, %v2754_v4  ;;  %v1528_v19 = vsel %vm3666_vm2, %v2768_v8, %v2769_v7 }
 0x529   : > { %v2584_v13 = vpack.c.bf16 %v1505_v6, %v1494_v10  ;;  %v1522_v14 = vpop.permute.xlu1 %1521  ;;  %v2762_v15 = vpop.permute.xlu0 %2761  ;;  %v2582_v16 = vpack.c.bf16 %v1506_v12, %v1495_v11  ;;  %vm1713_vm2 = vcmask 281752   ;;  %vm1893_vm11 = vcmask 412952  }
 0x52a   : > { %v2764_v17 = vunpack.i.h.bf16 %v2762_v15  ;;  %v2763_v18 = vunpack.i.l.bf16 %v2762_v15  ;;  %2599 = vmatpush3.bf16.msra.mxu1 %v2598_v9  ;;  %v1527_v20 = vsel %vm3667_vm3, %v1522_v14, %v2768_v8  ;;  %vm1735_vm3 = vcmask 429352  }
 0x52b   : > { %2583 = vmatprep.subr.bf16.mxu0 %v2582_v16  ;;  %2600 = vmatprep.subr.bf16.mxu1 %v2835_v55 }
 0x52c   : > { %v2601_v21 = vpack.c.bf16 %v2769_v7, %v2764_v17  ;;  %v1516_v22 = vsel %vm3668_vm15, %v1511_v36, %v2763_v18  ;;  %2585 = vmatpush1.bf16.msra.mxu0 %v2584_v13  ;;  %v1517_v23 = vsel %vm3669_vm0, %v2763_v18, %v2764_v17  ;;  %vm1757_vm15 = vcmask 576952  }
 0x52d   : > { %v2588_v24 = vpack.c.bf16 %v1527_v20, %v1516_v22  ;;  %v1537_v25 = vpop.permute.xlu1 %1536  ;;  %v1535_v26 = vpop.permute.xlu0 %1534  ;;  %v2586_v27 = vpack.c.bf16 %v1528_v19, %v1517_v23  ;;  %vm1779_vm0 = vcmask 724552  }
 0x52e   : > { %2602 = vmatpush3.bf16.msra.mxu1 %v2601_v21  ;;  %v1539_v29 = vsel %vm3670_vm13, %v1535_v26, %v1537_v25  ;;  %vm1691_vm13 = vcmask 568320  }
 0x52f   : > { %2587 = vmatprep.subr.bf16.mxu0 %v2586_v27  ;;  %2505 = vmatprep.subr.mxu1 %v3531_v28  ;;  %1692 = vst.msk [vmem:[#allocation3 + $0x8] sm:$0xf] %vm1691_vm13, %v3531_v28  ;;  %vm2003_vm13 = vcmask 1022976  }
 0x530   : > { %2589 = vmatpush1.bf16.msra.mxu0 %v2588_v24 }
 0x531   : > { %v1533_v31 = vpop.permute.xlu0 %1532  ;;  %1562 = vmatprep.subr.mxu0 %v1539_v29  ;;  %v1711_v33 = vpop.permute.xlu1 %1710 }
 0x532   : > { %v1538_v32 = vsel %vm3671_vm4, %v1533_v31, %v1535_v26  ;;  %2506 = vmatpush3.msra.mxu1 %v1537_v25  ;;  %1714 = vst.msk [vmem:[#allocation3] sm:$0xf] %vm1713_vm2, %v1711_v33  ;;  %vm1801_vm4 = vcmask 872152  }
 0x533   : > { %2508 = vmatmul.mubr.msk.f32.vlgmr.msra.gmra.mrb[4].mxu1 %vm3672_vm12, %v1452_v30  ;;  %2619 = vmatprep.subr.bf16.mxu1 %v2835_v55  ;;  %vm1847_vm12 = vcmask 1044472  }
 0x534   : > { %1563 = vmatpush1.msra.mxu0 %v1538_v32  ;;  %2528 = vmatprep.mubr.msk.f32.mxu1 %vm3673_vm14, %v3531_v28  ;;  %vm1848_vm14 = vcmask 121860  }
 0x535   : > { %2410 = vmatmul.mubr.msk.f32.vlgmr.msra.gmra.mrb[4].mxu0 %vm3674_vm6, %v1452_v30  ;;  %v1733_v34 = vpop.permute.xlu0 %1732  ;;  %v1755_v35 = vpop.permute.xlu1 %1754  ;;  %vm1823_vm6 = vcmask 1019752   ;;  %vm1849_vm2 = vmor %vm1848_vm14, %vm1847_vm12  ;;  %vm2007_vm12 = vcmask 105476   ;;  %vm1959_vm14 = vcmask 855752  }
 0x536   : > { %2240 = vmatprep.mubr.f32.mxu0 %v3531_v28  ;;  %1736 = vst.msk [vmem:[#allocation3] sm:$0xf] %vm1735_vm3, %v1733_v34  ;;  %vm1871_vm3 = vcmask 265352  }
 0x537   : > { %1758 = vst.msk [vmem:[#allocation3] sm:$0xf] %vm1757_vm15, %v1755_v35  ;;  %vm1915_vm15 = vcmask 560552  }
 0x539   : > { %v1777_v36 = vpop.permute.xlu0 %1776  ;;  %v1843_v37 = vpop.permute.xlu1 %1842 }
 0x53a   : > { %1780 = vst.msk [vmem:[#allocation3] sm:$0xf] %vm1779_vm0, %v1777_v36  ;;  %v1844_v39 = vrot.slane %v1843_v37, 4  ;;  %vm1937_vm0 = vcmask 708152  }
 0x53c   : > { %v1845_v40 = vsel %vm888_vm7, %v1844_v39, %v1843_v37 }
 0x53d   : > { %v1799_v38 = vpop.permute.xlu0 %1798  ;;  %v1821_v41 = vpop.permute.xlu1 %1820 }
 0x53e   : > { %1802 = vst.msk [vmem:[#allocation3] sm:$0xf] %vm1801_vm4, %v1799_v38  ;;  %vm2006_vm4 = vcmask 1044456  }
 0x53f   : > { %1824 = vst.msk [vmem:[#allocation3] sm:$0xf] %vm1823_vm6, %v1821_v41  ;;  %vm2008_vm6 = vmor %vm2007_vm12, %vm2006_vm4  ;;  %vm3686_vm12 = vcmask 736256  }
 0x540   : > { %1850 = vst.msk [vmem:[#allocation3] sm:$0xff] %vm1849_vm2, %v1845_v40  ;;  %vm2030_vm2 = vcmask 248952  }
 0x541   : > { %v1869_v42 = vpop.permute.xlu0 %1868  ;;  %v1891_v43 = vpop.permute.xlu1 %1890 }
 0x542   : > { %1872 = vst.msk [vmem:[#allocation3 + $0x4] sm:$0xf] %vm1871_vm3, %v1869_v42 }
 0x543   : > { %1894 = vst.msk [vmem:[#allocation3 + $0x4] sm:$0xf] %vm1893_vm11, %v1891_v43  ;;  %vm2052_vm11 = vcmask 396552  }
 0x545   : > { %v1913_v44 = vpop.permute.xlu0 %1912  ;;  %v1935_v45 = vpop.permute.xlu1 %1934 }
 0x546   : > { %1916 = vst.msk [vmem:[#allocation3 + $0x4] sm:$0xf] %vm1915_vm15, %v1913_v44 }
 0x547   : > { %1938 = vst.msk [vmem:[#allocation3 + $0x4] sm:$0xf] %vm1937_vm0, %v1935_v45 }
 0x549   : > { %v2001_v51 = vpop.permute.xlu0 %2000  ;;  %v1957_v49 = vpop.permute.xlu1 %1956 }
 0x54a   : > { %v2002_v46 = vrot.slane %v2001_v51, 4  ;;  %1960 = vst.msk [vmem:[#allocation3 + $0x4] sm:$0xf] %vm1959_vm14, %v1957_v49  ;;  %vm3687_vm14 = vmmov %vm3686_vm12 }
 0x54c   : > { %v2004_v48 = vsel %vm2003_vm13, %v2002_v46, %v2001_v51  ;;  %vm3684_vm13 = vcmask 752640  }
 0x54d   : > { %v1979_v53 = vpop.permute.xlu0 %1978  ;;  %v2028_v54 = vpop.permute.xlu1 %2027  ;;  %vm3685_vm4 = vmmov %vm3684_vm13 }
 0x54e   : > { %1982 = vst.msk [vmem:[#allocation3 + $0x4] sm:$0xf] %vm1981_vm10, %v1979_v53  ;;  %vm3675_vm10 = vcmask 1043456  }
 0x54f   : > { %2009 = vst.msk [vmem:[#allocation3 + $0x4] sm:$0xff] %vm2008_vm6, %v2004_v48  ;;  %vm3676_vm3 = vmmov %vm3675_vm10  ;;  %vm3688_vm6 = vcmask 588800  }
 0x550   : > { %2031 = vst.msk [vmem:[#allocation3 + $0x8] sm:$0xf] %vm2030_vm2, %v2028_v54  ;;  %vm3677_vm15 = vmmov %vm3676_vm3 }
 0x551   : > { %v2050_v56 = vpop.permute.xlu0 %2049  ;;  %vm3689_vm2 = vmmov %vm3688_vm6 }
 0x552   : > { %2053 = vst.msk [vmem:[#allocation3 + $0x8] sm:$0xf] %vm2052_vm11, %v2050_v56  ;;  %vm2322_vm11 = vcmask 257024  }
 0x556   : > { %v2054_v62 = vld [vmem:[#allocation3] sm:$0xff] }
 0x557   : > { %v2074_v0 = vcombine.low %v2054_v62, %v2054_v62 }
 0x606   : > { %v1683_v57 = vpop.f32.mrb[4].mxu1 }
 0x607   : > { %v1689_v58 = vmul.f32 %v1683_v57, %v3216_v63  ;;  %v2509_v50 = vpop.f32.mrb[5].mxu1 }
 0x608   : > { %v1612_v59 = vpop.f32.mrb[4].mxu0 }
 0x609   : > { %v1614_v60 = vpop.f32.mrb[5].mxu0  ;;  %2063 = vrot.lane.b32.xlu0 %v1689_v58, %s2819_s8  ;;  %v1687_v61 = vmul.f32 %v1612_v59, %v3218_v1  ;;  %v2805_v1 = vld [vmem:[#allocation3 + $0x8] ss:$0 sps:$4 sm:$0xff]  }
 0x60a   : > { %v1688_v47 = vmul.f32 %v1614_v60, %v3220_v2 }
 0x60c   : > { %2061 = vrot.lane.b32.xlu1 %v1688_v47, %s2819_s8 }
 0x610   : > { %2059 = vrot.lane.b32.xlu1 %v1687_v61, %s2819_s8 }
 0x67b   : > { %v2064_v5 = vpop.permute.xlu0 %2063 }
 0x67e   : > { %v2062_v52 = vpop.permute.xlu1 %2061 }
 0x67f   : > { %v2066_v2 = vsel %vm1160_vm5, %v2062_v52, %v2064_v5 }
 0x680   : > { %v2071_v7 = vsel %vm1167_vm1, %v2066_v2, 0.0  ;;  %vm3678_vm1 = vcmask 883712  }
 0x681   : > { %v2080_v9 = vsel %vm3677_vm15, %v2071_v7, %v2805_v1  ;;  %v2081_v7 = vld [vmem:[%s3614_s5] sm:$0xf] }
 0x682   : > { %v2060_v3 = vpop.permute.xlu1 %2059 }
 0x683   : > { %v2070_v4 = vsel %vm1160_vm5, 0.0, %v2060_v3  ;;  %v2065_v6 = vsel %vm1160_vm5, %v2060_v3, %v2062_v52  ;;  %vm3679_vm5 = vcmask 891904  }
 0x684   : > { %v2078_v63 = vsel %vm3675_vm10, %v2070_v4, %v2074_v0  ;;  %v2079_v8 = vsel %vm3676_vm3, %v2065_v6, %v2054_v62 }
 0x685   : > { %2096 = vrot.lane.b32.xlu0 %v2078_v63, %s2834_s23  ;;  %2085 = vrot.lane.b32.xlu1 %v2078_v63, %s2818_s30  ;;  %v2780_v10 = vpack.i.bf16 %v2080_v9, %v2079_v8 }
 0x689   : > { %2118 = vrot.lane.b32.xlu0 %v2078_v63, %s2832_s21  ;;  %2107 = vrot.lane.b32.xlu1 %v2078_v63, %s2836_s26 }
 0x68d   : > { %2140 = vrot.lane.b32.xlu0 %v2078_v63, %s2837_s27  ;;  %2129 = vrot.lane.b32.xlu1 %v2078_v63, %s2838_s28 }
 0x691   : > { %2781 = vrot.lane.b32.xlu1 %v2780_v10, %s2836_s26  ;;  %2771 = vrot.lane.b32.xlu0 %v2780_v10, %s2818_s30 }
 0x695   : > { %2791 = vrot.lane.b32.xlu1 %v2780_v10, %s2838_s28  ;;  %2776 = vrot.lane.b32.xlu0 %v2780_v10, %s2834_s23 }
 0x699   : > { %2801 = vrot.lane.b32.xlu1 %v2780_v10, %s2829_s18  ;;  %2786 = vrot.lane.b32.xlu0 %v2780_v10, %s2832_s21 }
 0x69d   : > { %2151 = vrot.lane.b32.xlu1 %v2078_v63, %s2829_s18  ;;  %2796 = vrot.lane.b32.xlu0 %v2780_v10, %s2837_s27  ;;  %s298_s18 = scalar_lea.vmem %s3616_s7, %s2631_s15 }
 0x6a1   : > { %2166 = vrot.lane.b32.xlu1 %v2080_v9, %s2840_s29  ;;  %2164 = vrot.lane.b32.xlu0 %v2079_v8, %s2840_s29 }
 0x6a5   : > { %2162 = vrot.lane.b32.xlu0 %v2078_v63, %s2840_s29 }
 0x6f7   : > { %v2097_v11 = vpop.permute.xlu0 %2096  ;;  %v2086_v12 = vpop.permute.xlu1 %2085 }
 0x6fb   : > { %v2119_v13 = vpop.permute.xlu0 %2118  ;;  %v2108_v14 = vpop.permute.xlu1 %2107 }
 0x6ff   : > { %v2141_v15 = vpop.permute.xlu0 %2140  ;;  %v2130_v16 = vpop.permute.xlu1 %2129 }
 0x703   : > { %v2782_v17 = vpop.permute.xlu1 %2781  ;;  %v2772_v18 = vpop.permute.xlu0 %2771 }
 0x704   : > { %v2774_v19 = vunpack.i.h.bf16 %v2772_v18  ;;  %v2773_v20 = vunpack.i.l.bf16 %v2772_v18  ;;  %v2784_v21 = vunpack.i.h.bf16 %v2782_v17  ;;  %v2783_v22 = vunpack.i.l.bf16 %v2782_v17 }
 0x706   : > { %v2620_v23 = vpack.c.bf16 %v2774_v19, %v2080_v9  ;;  %v2091_v24 = vsel %vm888_vm7, %v2086_v12, %v2773_v20  ;;  %v2092_v25 = vsel %vm888_vm7, %v2773_v20, %v2774_v19  ;;  %v2113_v33 = vsel %vm912_vm8, %v2108_v14, %v2783_v22  ;;  %vm3680_vm7 = vmmov %vm3679_vm5 }
 0x707   : > { %v2605_v26 = vpack.c.bf16 %v2091_v24, %v2078_v63  ;;  %v2792_v27 = vpop.permute.xlu1 %2791  ;;  %v2777_v29 = vpop.permute.xlu0 %2776  ;;  %v2603_v30 = vpack.c.bf16 %v2092_v25, %v2079_v8  ;;  %v2114_v35 = vsel %vm912_vm8, %v2783_v22, %v2784_v21  ;;  %vm3681_vm8 = vmmov %vm3678_vm1 }
 0x708   : > { %v2779_v31 = vunpack.i.h.bf16 %v2777_v29  ;;  %v2778_v32 = vunpack.i.l.bf16 %v2777_v29  ;;  %2621 = vmatpush3.bf16.msra.mxu1 %v2620_v23  ;;  %v2793_v34 = vunpack.i.l.bf16 %v2792_v27  ;;  %v2794_v36 = vunpack.i.h.bf16 %v2792_v27 }
 0x709   : > { %2604 = vmatprep.subr.bf16.mxu0 %v2603_v30  ;;  %2622 = vmatprep.subr.bf16.mxu1 %v2835_v55 }
 0x70a   : > { %v2623_v37 = vpack.c.bf16 %v2784_v21, %v2779_v31  ;;  %v2102_v38 = vsel %vm900_vm9, %v2097_v11, %v2778_v32  ;;  %2606 = vmatpush1.bf16.msra.mxu0 %v2605_v26  ;;  %v2103_v39 = vsel %vm900_vm9, %v2778_v32, %v2779_v31  ;;  %v2135_v51 = vsel %vm3678_vm1, %v2130_v16, %v2793_v34 }
 0x70b   : > { %v2609_v40 = vpack.c.bf16 %v2113_v33, %v2102_v38  ;;  %v2802_v41 = vpop.permute.xlu1 %2801  ;;  %v2787_v42 = vpop.permute.xlu0 %2786  ;;  %v2607_v43 = vpack.c.bf16 %v2114_v35, %v2103_v39  ;;  %v2136_v56 = vsel %vm3681_vm8, %v2793_v34, %v2794_v36  ;;  %vm3682_vm9 = vcmask 744448  }
 0x70c   : > { %v2789_v44 = vunpack.i.h.bf16 %v2787_v42  ;;  %v2788_v45 = vunpack.i.l.bf16 %v2787_v42  ;;  %2624 = vmatpush3.bf16.msra.mxu1 %v2623_v37  ;;  %v2804_v46 = vunpack.i.h.bf16 %v2802_v41  ;;  %v2803_v48 = vunpack.i.l.bf16 %v2802_v41  ;;  %vm3683_vm0 = vmmov %vm3682_vm9 }
 0x70d   : > { %2608 = vmatprep.subr.bf16.mxu0 %v2607_v43  ;;  %2625 = vmatprep.subr.bf16.mxu1 %v2835_v55 }
 0x70e   : > { %v2626_v49 = vpack.c.bf16 %v2794_v36, %v2789_v44  ;;  %v2124_v53 = vsel %vm3679_vm5, %v2119_v13, %v2788_v45  ;;  %2610 = vmatpush1.bf16.msra.mxu0 %v2609_v40  ;;  %v2125_v54 = vsel %vm3680_vm7, %v2788_v45, %v2789_v44  ;;  %v2158_v61 = vsel %vm3682_vm9, %v2803_v48, %v2804_v46 }
 0x70f   : > { %v2613_v57 = vpack.c.bf16 %v2135_v51, %v2124_v53  ;;  %v2152_v58 = vpop.permute.xlu1 %2151  ;;  %v2797_v50 = vpop.permute.xlu0 %2796  ;;  %v2611_v59 = vpack.c.bf16 %v2136_v56, %v2125_v54 }
 0x710   : > { %v2799_v60 = vunpack.i.h.bf16 %v2797_v50  ;;  %v2798_v47 = vunpack.i.l.bf16 %v2797_v50  ;;  %2627 = vmatpush3.bf16.msra.mxu1 %v2626_v49  ;;  %v2157_v52 = vsel %vm3683_vm0, %v2152_v58, %v2803_v48 }
 0x711   : > { %2612 = vmatprep.subr.bf16.mxu0 %v2611_v59  ;;  %2628 = vmatprep.subr.bf16.mxu1 %v2835_v55 }
 0x712   : > { %v2629_v62 = vpack.c.bf16 %v2804_v46, %v2799_v60  ;;  %v2146_v0 = vsel %vm3684_vm13, %v2141_v15, %v2798_v47  ;;  %2614 = vmatpush1.bf16.msra.mxu0 %v2613_v57  ;;  %v2147_v3 = vsel %vm3685_vm4, %v2798_v47, %v2799_v60 }
 0x713   : > { %v2617_v4 = vpack.c.bf16 %v2157_v52, %v2146_v0  ;;  %v2167_v63 = vpop.permute.xlu1 %2166  ;;  %v2165_v5 = vpop.permute.xlu0 %2164  ;;  %v2615_v2 = vpack.c.bf16 %v2158_v61, %v2147_v3 }
 0x714   : > { %2630 = vmatpush3.bf16.msra.mxu1 %v2629_v62  ;;  %v2169_v55 = vsel %vm3686_vm12, %v2165_v5, %v2167_v63 }
 0x715   : > { %2616 = vmatprep.subr.bf16.mxu0 %v2615_v2  ;;  %2526 = vmatprep.subr.mxu1 %v3531_v28 }
 0x716   : > { %2618 = vmatpush1.bf16.msra.mxu0 %v2617_v4 }
 0x717   : > { %v2163_v6 = vpop.permute.xlu0 %2162  ;;  %2192 = vmatprep.subr.mxu0 %v2169_v55 }
 0x718   : > { %v2168_v1 = vsel %vm3687_vm14, %v2163_v6, %v2165_v5  ;;  %2527 = vmatpush3.msra.mxu1 %v2167_v63 }
 0x719   : > { %2529 = vmatmul.mubr.msk.f32.vlgmr.msra.gmra.mrb[6].mxu1 %vm3688_vm6, %v2081_v7 }
 0x71a   : > { %2193 = vmatpush1.msra.mxu0 %v2168_v1 }
 0x71b   : > { %2413 = vmatmul.mubr.msk.f32.vlgmr.msra.gmra.mrb[6].mxu0 %vm3689_vm2, %v2081_v7 }
 0x7ec   : > { %v2313_v28 = vpop.f32.mrb[6].mxu1 }
 0x7ed   : > { %2323 = vst.msk [vmem:[%s298_s18 + $0x8] sm:$0xf] %vm2322_vm11, %v2313_v28  ;;  %v2530_v8 = vpop.f32.mrb[7].mxu1 }
 0x7ee   : > { %v2242_v9 = vpop.f32.mrb[6].mxu0 }
 0x7ef   : > { %v2244_v10 = vpop.f32.mrb[7].mxu0 }
 0x7f0   : > { %v2319_v11 = vcombine.low %v2242_v9, %v2244_v10 }
 0x7f2   : > { %2321 = vst [vmem:[%s298_s18] sm:$0xff] %v2319_v11 }
 0x7f3 PF: > { %s17_s24 = sadd.s32 1, %s2815_s24  }
 0x7f4   : > { %p14_p4 = scmp.ge.s32.totalorder %s17_s24, 4  }
 0x7f6   :  { %16 = sbr.rel (!%p14_p4) target bundleno = 1 (0x1), region = 81 }

</bundles_post_ra>
